<compile_context>
chip_gen: v6e
topology: v6e:2x2x1
jax: 0.10.0
libtpu: 0.0.40
codegen_flags: <defaults>
</compile_context>

<pallas_src>
import functools

import jax
import jax.numpy as jnp
from jax.experimental import pallas as pl
from jax.experimental.pallas import tpu as pltpu

GATE = 128   # lanes per gate block (hidden_size padded up to 128)
KH = 128     # contraction rows reserved for the hidden state
KX = 128     # contraction rows reserved for the input


def _rollout_kernel(x_ref, h0_ref, wx_ref, bx_ref, wh_ref, bh_ref,
                    wfc_ref, bfc_ref, logits_ref, hT_ref, hseq_ref, *, T):
    """T GRU steps + output projection, entirely in VMEM.

    x_ref      : (T_pad, KX)      per-step inputs, zero-padded
    h0_ref     : (1, KH)          initial hidden state, zero-padded
    wx_ref     : (KX, 3*GATE)     x-projection weights  [r | z | i_n]
    bx_ref     : (1, 3*GATE)      biases folded into gx [b_ir+b_hr | b_iz+b_hz | b_in]
    wh_ref     : (KH, 3*GATE)     recurrent weights     [r | z | h_n]
    bh_ref     : (1, 3*GATE)      recurrent bias        [0 | 0 | b_hn]
    wfc_ref    : (KH, GATE)       padded fc weight (only [0:H, 0:A] nonzero)
    bfc_ref    : (1, GATE)        padded fc bias
    logits_ref : (T_pad, GATE)    per-step logits (rows [0:T], lanes [0:A] valid)
    hT_ref     : (1, KH)          final hidden state
    hseq_ref   : (T_pad, KH)      VMEM scratch holding h_1..h_T
    """
    # --- hoisted x-projection: one matmul for all T steps ------------------
    gx = (jnp.dot(x_ref[...], wx_ref[...], preferred_element_type=jnp.float32)
          + bx_ref[...])                                   # (T_pad, 3*GATE)

    wh = wh_ref[...]
    bh = bh_ref[...]
    hseq_ref[...] = jnp.zeros_like(hseq_ref)

    # --- serial recurrence: only the (1,128)@(128,384) h-dot per step ------
    h = h0_ref[...]                                        # (1, KH)
    for t in range(T):                                     # T static & small
        gh = jnp.dot(h, wh, preferred_element_type=jnp.float32) + bh  # (1, 3*GATE)
        gxt = gx[t:t + 1, :]                               # static row slice
        r = jax.nn.sigmoid(gxt[:, 0:GATE] + gh[:, 0:GATE])
        z = jax.nn.sigmoid(gxt[:, GATE:2 * GATE] + gh[:, GATE:2 * GATE])
        n = jnp.tanh(gxt[:, 2 * GATE:3 * GATE] + r * gh[:, 2 * GATE:3 * GATE])
        h = (1.0 - z) * n + z * h                          # padded lanes stay 0
        hseq_ref[t:t + 1, :] = h                           # static-index VMEM store
    hT_ref[...] = h.astype(hT_ref.dtype)

    # --- hoisted fc: one (T_pad,128)@(128,128) matmul + full-tile store ----
    logits = (jnp.dot(hseq_ref[...], wfc_ref[...],
                      preferred_element_type=jnp.float32) + bfc_ref[...])
    logits_ref[...] = logits.astype(logits_ref.dtype)


def pack_params(params, num_actions, hidden_size):
    """One-time packing of PyTorch-layout GRUCell/Linear params.

    PyTorch gate order: rows [r | z | n] of weight_ih (3H,A) / weight_hh (3H,H).
    wx columns (3 blocks of 128 lanes): r, z, i_n  (x contributions).
    wh columns (3 blocks of 128 lanes): r, z, h_n  (h contributions).
    r/z biases are pre-summed into bx; b_hh_n stays with wh (r multiplies h_n).
    """
    A, H = num_actions, hidden_size
    w_ih = params["weight_ih"].astype(jnp.float32)   # (3H, A)
    w_hh = params["weight_hh"].astype(jnp.float32)   # (3H, H)
    b_ih = params["bias_ih"].astype(jnp.float32)     # (3H,)
    b_hh = params["bias_hh"].astype(jnp.float32)     # (3H,)

    wx = jnp.zeros((KX, 3 * GATE), jnp.float32)
    wx = wx.at[0:A, 0:H].set(w_ih[0:H, :].T)                         # r
    wx = wx.at[0:A, GATE:GATE + H].set(w_ih[H:2 * H, :].T)           # z
    wx = wx.at[0:A, 2 * GATE:2 * GATE + H].set(w_ih[2 * H:3 * H, :].T)  # i_n

    bx = jnp.zeros((1, 3 * GATE), jnp.float32)
    bx = bx.at[0, 0:H].set(b_ih[0:H] + b_hh[0:H])
    bx = bx.at[0, GATE:GATE + H].set(b_ih[H:2 * H] + b_hh[H:2 * H])
    bx = bx.at[0, 2 * GATE:2 * GATE + H].set(b_ih[2 * H:3 * H])

    wh = jnp.zeros((KH, 3 * GATE), jnp.float32)
    wh = wh.at[0:H, 0:H].set(w_hh[0:H, :].T)                          # r
    wh = wh.at[0:H, GATE:GATE + H].set(w_hh[H:2 * H, :].T)            # z
    wh = wh.at[0:H, 2 * GATE:2 * GATE + H].set(w_hh[2 * H:3 * H, :].T)  # h_n

    bh = jnp.zeros((1, 3 * GATE), jnp.float32)
    bh = bh.at[0, 2 * GATE:2 * GATE + H].set(b_hh[2 * H:3 * H])

    wfc = jnp.zeros((KH, GATE), jnp.float32)
    wfc = wfc.at[0:H, 0:A].set(params["fc_weight"].astype(jnp.float32).T)
    bfc = jnp.zeros((1, GATE), jnp.float32)
    bfc = bfc.at[0, 0:A].set(params["fc_bias"].astype(jnp.float32))

    return {"wx": wx, "bx": bx, "wh": wh, "bh": bh, "wfc": wfc, "bfc": bfc}


def _rollout_impl(xs, h0, packed, num_actions, hidden_size):
    A, H = num_actions, hidden_size
    T = xs.shape[0]
    T_pad = max(8, ((T + 7) // 8) * 8)      # full (8,128) tiles for stores

    x_pad = jnp.zeros((T_pad, KX), jnp.float32).at[:T, :A].set(xs.astype(jnp.float32))
    h_pad = jnp.zeros((1, KH), jnp.float32).at[0, :H].set(h0.astype(jnp.float32))

    vmem = pl.BlockSpec(memory_space=pltpu.VMEM)
    logits_pad, hT_pad = pl.pallas_call(
        functools.partial(_rollout_kernel, T=T),
        out_shape=(
            jax.ShapeDtypeStruct((T_pad, GATE), jnp.float32),
            jax.ShapeDtypeStruct((1, KH), jnp.float32),
        ),
        in_specs=[vmem] * 8,
        out_specs=(vmem, vmem),
        scratch_shapes=[pltpu.VMEM((T_pad, KH), jnp.float32)],
    )(x_pad, h_pad, packed["wx"], packed["bx"], packed["wh"], packed["bh"],
      packed["wfc"], packed["bfc"])

    return logits_pad[:T, :A], hT_pad[0, :H]


@functools.partial(jax.jit, static_argnums=(3, 4))
def controller_rollout(xs, h0, packed, num_actions=9, hidden_size=64):
    """Run T GRU+fc steps inside one kernel. xs: (T, A), h0: (H,)
    -> (logits (T, A), h_T (H,))."""
    return _rollout_impl(xs, h0, packed, num_actions, hidden_size)


@functools.partial(jax.jit, static_argnums=(3, 4))
def controller_forward(x, h, packed, num_actions=9, hidden_size=64):
    """Single Controller.forward step: x (A,), h (H,) -> (logits (A,), h_new (H,))."""
    logits, hT = _rollout_impl(x[None, :], h, packed, num_actions, hidden_size)
    return logits[0], hT


def init_params(key, num_actions=9, hidden_size=64):
    # Deterministic synthetic init matching PyTorch GRUCell / Linear shapes.
    k = jax.random.split(key, 6)
    s = 1.0 / jnp.sqrt(hidden_size)
    return {
        "weight_ih": jax.random.uniform(k[0], (3 * hidden_size, num_actions), jnp.float32, -s, s),
        "weight_hh": jax.random.uniform(k[1], (3 * hidden_size, hidden_size), jnp.float32, -s, s),
        "bias_ih":   jax.random.uniform(k[2], (3 * hidden_size,), jnp.float32, -s, s),
        "bias_hh":   jax.random.uniform(k[3], (3 * hidden_size,), jnp.float32, -s, s),
        "fc_weight": jax.random.uniform(k[4], (num_actions, hidden_size), jnp.float32, -s, s),
        "fc_bias":   jax.random.uniform(k[5], (num_actions,), jnp.float32, -s, s),
    }


def _reference_forward(x, h, p):
    H = h.shape[0]
    gi = x @ p["weight_ih"].T + p["bias_ih"]
    gh = h @ p["weight_hh"].T + p["bias_hh"]
    r = jax.nn.sigmoid(gi[0:H] + gh[0:H])
    z = jax.nn.sigmoid(gi[H:2 * H] + gh[H:2 * H])
    n = jnp.tanh(gi[2 * H:] + r * gh[2 * H:])
    h_new = (1.0 - z) * n + z * h
    logits = h_new @ p["fc_weight"].T + p["fc_bias"]
    return logits, h_new


# TODO(synk): step()/generate_rollout() sampling (Categorical), reward shaping
# and the Adam/REINFORCE optimize() are host-side control/training logic and
# are intentionally not part of the kernel.

if __name__ == "__main__":
    num_actions = 9      # len(index_to_action)
    hidden_size = 64
    T = 6                # max_depth-length rollout

    key = jax.random.PRNGKey(0)
    kp, kh, kx = jax.random.split(key, 3)
    params = init_params(kp, num_actions, hidden_size)
    packed = pack_params(params, num_actions, hidden_size)

    h0 = jax.random.normal(kh, (hidden_size,), jnp.float32)
    # step() always feeds x = zeros(num_actions); use random per-step inputs
    # here to exercise the full forward path, plus a zero-x check below.
    xs = jax.random.normal(kx, (T, num_actions), jnp.float32)

    # --- multi-step rollout, one kernel launch ---------------------------
    logits_seq, h_T = controller_rollout(xs, h0, packed, num_actions, hidden_size)
    jax.block_until_ready((logits_seq, h_T))

    ref_logits = []
    h_ref = h0
    for t in range(T):
        lg, h_ref = _reference_forward(xs[t], h_ref, params)
        ref_logits.append(lg)
    ref_logits = jnp.stack(ref_logits)

    assert jnp.allclose(logits_seq, ref_logits, atol=1e-4, rtol=1e-4), "rollout logits mismatch"
    assert jnp.allclose(h_T, h_ref, atol=1e-4, rtol=1e-4), "rollout hidden mismatch"

    # --- single Controller.forward step (x = zeros, as in step()) --------
    x0 = jnp.zeros((num_actions,), jnp.float32)
    logits1, h1 = controller_forward(x0, h0, packed, num_actions, hidden_size)
    jax.block_until_ready((logits1, h1))
    ref_l1, ref_h1 = _reference_forward(x0, h0, params)
    assert jnp.allclose(logits1, ref_l1, atol=1e-4, rtol=1e-4), "forward logits mismatch"
    assert jnp.allclose(h1, ref_h1, atol=1e-4, rtol=1e-4), "forward hidden mismatch"

    print("KERNEL_OK")
</pallas_src>

<mosaic_0001>
module attributes {stable_mosaic.version = 11 : i64} {
  func.func @_rollout_kernel(%arg0: memref<8x128xf32, #tpu.memory_space<vmem>>, %arg1: memref<1x128xf32, #tpu.memory_space<vmem>>, %arg2: memref<128x384xf32, #tpu.memory_space<vmem>>, %arg3: memref<1x384xf32, #tpu.memory_space<vmem>>, %arg4: memref<128x384xf32, #tpu.memory_space<vmem>>, %arg5: memref<1x384xf32, #tpu.memory_space<vmem>>, %arg6: memref<128x128xf32, #tpu.memory_space<vmem>>, %arg7: memref<1x128xf32, #tpu.memory_space<vmem>>, %arg8: memref<8x128xf32, #tpu.memory_space<vmem>>, %arg9: memref<1x128xf32, #tpu.memory_space<vmem>>, %arg10: memref<8x128xf32, #tpu.memory_space<vmem>>) attributes {dimension_semantics = [], scalar_prefetch = 0 : i64, scratch_operands = 1 : i64, tpu.core_type = #tpu.core_type<tc>} {
    %c0 = arith.constant 0 : index
    %c0_0 = arith.constant 0 : index
    %0 = vector.load %arg0[%c0, %c0_0] : memref<8x128xf32, #tpu.memory_space<vmem>>, vector<8x128xf32>
    %c0_1 = arith.constant 0 : index
    %c0_2 = arith.constant 0 : index
    %1 = vector.load %arg2[%c0_1, %c0_2] : memref<128x384xf32, #tpu.memory_space<vmem>>, vector<128x384xf32>
    %cst = arith.constant dense<0.000000e+00> : vector<8x384xf32>
    %2 = tpu.matmul %0, %1, %cst {dimension_numbers = #tpu.dot_dimension_numbers<[1], [0], [0], [1], [0, 0, 1, 1], [], []>} : vector<8x128xf32>, vector<128x384xf32>, vector<8x384xf32> -> vector<8x384xf32>
    %c0_3 = arith.constant 0 : index
    %c0_4 = arith.constant 0 : index
    %3 = vector.load %arg3[%c0_3, %c0_4] : memref<1x384xf32, #tpu.memory_space<vmem>>, vector<1x384xf32>
    %4 = vector.broadcast %3 : vector<1x384xf32> to vector<8x384xf32>
    %5 = arith.addf %2, %4 : vector<8x384xf32>
    %c0_5 = arith.constant 0 : index
    %c0_6 = arith.constant 0 : index
    %6 = vector.load %arg4[%c0_5, %c0_6] : memref<128x384xf32, #tpu.memory_space<vmem>>, vector<128x384xf32>
    %c0_7 = arith.constant 0 : index
    %c0_8 = arith.constant 0 : index
    %7 = vector.load %arg5[%c0_7, %c0_8] : memref<1x384xf32, #tpu.memory_space<vmem>>, vector<1x384xf32>
    %cst_9 = arith.constant 0.000000e+00 : f32
    %8 = vector.broadcast %cst_9 : f32 to vector<8x128xf32>
    %c0_10 = arith.constant 0 : index
    %c0_11 = arith.constant 0 : index
    %9 = vector.load %arg10[%c0_10, %c0_11] : memref<8x128xf32, #tpu.memory_space<vmem>>, vector<8x128xf32>
    tpu.vector_store %arg10[%c0_10, %c0_11], %8 {strides = array<i32>} : memref<8x128xf32, #tpu.memory_space<vmem>>, vector<8x128xf32>,
    %c0_12 = arith.constant 0 : index
    %c0_13 = arith.constant 0 : index
    %10 = vector.load %arg1[%c0_12, %c0_13] : memref<1x128xf32, #tpu.memory_space<vmem>>, vector<1x128xf32>
    %cst_14 = arith.constant dense<0.000000e+00> : vector<1x384xf32>
    %11 = tpu.matmul %10, %6, %cst_14 {dimension_numbers = #tpu.dot_dimension_numbers<[1], [0], [0], [1], [0, 0, 1, 1], [], []>} : vector<1x128xf32>, vector<128x384xf32>, vector<1x384xf32> -> vector<1x384xf32>
    %12 = arith.addf %11, %7 : vector<1x384xf32>
    %13 = vector.extract_strided_slice %5 {offsets = [0, 0], sizes = [1, 384], strides = [1, 1]} : vector<8x384xf32> to vector<1x384xf32>
    %14 = vector.extract_strided_slice %13 {offsets = [0, 0], sizes = [1, 128], strides = [1, 1]} : vector<1x384xf32> to vector<1x128xf32>
    %15 = vector.extract_strided_slice %12 {offsets = [0, 0], sizes = [1, 128], strides = [1, 1]} : vector<1x384xf32> to vector<1x128xf32>
    %16 = arith.addf %14, %15 : vector<1x128xf32>
    %17 = arith.negf %16 : vector<1x128xf32>
    %18 = math.exp %17 : vector<1x128xf32>
    %cst_15 = arith.constant 1.000000e+00 : f32
    %19 = vector.broadcast %cst_15 : f32 to vector<1x128xf32>
    %20 = arith.addf %19, %18 : vector<1x128xf32>
    %21 = arith.divf %19, %20 : vector<1x128xf32>
    %22 = vector.extract_strided_slice %13 {offsets = [0, 128], sizes = [1, 128], strides = [1, 1]} : vector<1x384xf32> to vector<1x128xf32>
    %23 = vector.extract_strided_slice %12 {offsets = [0, 128], sizes = [1, 128], strides = [1, 1]} : vector<1x384xf32> to vector<1x128xf32>
    %24 = arith.addf %22, %23 : vector<1x128xf32>
    %25 = arith.negf %24 : vector<1x128xf32>
    %26 = math.exp %25 : vector<1x128xf32>
    %cst_16 = arith.constant 1.000000e+00 : f32
    %27 = vector.broadcast %cst_16 : f32 to vector<1x128xf32>
    %28 = arith.addf %27, %26 : vector<1x128xf32>
    %29 = arith.divf %27, %28 : vector<1x128xf32>
    %30 = vector.extract_strided_slice %13 {offsets = [0, 256], sizes = [1, 128], strides = [1, 1]} : vector<1x384xf32> to vector<1x128xf32>
    %31 = vector.extract_strided_slice %12 {offsets = [0, 256], sizes = [1, 128], strides = [1, 1]} : vector<1x384xf32> to vector<1x128xf32>
    %32 = arith.mulf %21, %31 : vector<1x128xf32>
    %33 = arith.addf %30, %32 : vector<1x128xf32>
    %34 = math.tanh %33 : vector<1x128xf32>
    %cst_17 = arith.constant 1.000000e+00 : f32
    %35 = vector.broadcast %cst_17 : f32 to vector<1x128xf32>
    %36 = arith.subf %35, %29 : vector<1x128xf32>
    %37 = arith.mulf %36, %34 : vector<1x128xf32>
    %38 = arith.mulf %29, %10 : vector<1x128xf32>
    %39 = arith.addf %37, %38 : vector<1x128xf32>
    %c0_18 = arith.constant 0 : index
    %c0_19 = arith.constant 0 : index
    %40 = vector.load %arg10[%c0_18, %c0_19] : memref<8x128xf32, #tpu.memory_space<vmem>>, vector<1x128xf32>
    tpu.vector_store %arg10[%c0_18, %c0_19], %39 {strides = array<i32>} : memref<8x128xf32, #tpu.memory_space<vmem>>, vector<1x128xf32>,
    %cst_20 = arith.constant dense<0.000000e+00> : vector<1x384xf32>
    %41 = tpu.matmul %39, %6, %cst_20 {dimension_numbers = #tpu.dot_dimension_numbers<[1], [0], [0], [1], [0, 0, 1, 1], [], []>} : vector<1x128xf32>, vector<128x384xf32>, vector<1x384xf32> -> vector<1x384xf32>
    %42 = arith.addf %41, %7 : vector<1x384xf32>
    %43 = vector.extract_strided_slice %5 {offsets = [1, 0], sizes = [1, 384], strides = [1, 1]} : vector<8x384xf32> to vector<1x384xf32>
    %44 = vector.extract_strided_slice %43 {offsets = [0, 0], sizes = [1, 128], strides = [1, 1]} : vector<1x384xf32> to vector<1x128xf32>
    %45 = vector.extract_strided_slice %42 {offsets = [0, 0], sizes = [1, 128], strides = [1, 1]} : vector<1x384xf32> to vector<1x128xf32>
    %46 = arith.addf %44, %45 : vector<1x128xf32>
    %47 = arith.negf %46 : vector<1x128xf32>
    %48 = math.exp %47 : vector<1x128xf32>
    %cst_21 = arith.constant 1.000000e+00 : f32
    %49 = vector.broadcast %cst_21 : f32 to vector<1x128xf32>
    %50 = arith.addf %49, %48 : vector<1x128xf32>
    %51 = arith.divf %49, %50 : vector<1x128xf32>
    %52 = vector.extract_strided_slice %43 {offsets = [0, 128], sizes = [1, 128], strides = [1, 1]} : vector<1x384xf32> to vector<1x128xf32>
    %53 = vector.extract_strided_slice %42 {offsets = [0, 128], sizes = [1, 128], strides = [1, 1]} : vector<1x384xf32> to vector<1x128xf32>
    %54 = arith.addf %52, %53 : vector<1x128xf32>
    %55 = arith.negf %54 : vector<1x128xf32>
    %56 = math.exp %55 : vector<1x128xf32>
    %cst_22 = arith.constant 1.000000e+00 : f32
    %57 = vector.broadcast %cst_22 : f32 to vector<1x128xf32>
    %58 = arith.addf %57, %56 : vector<1x128xf32>
    %59 = arith.divf %57, %58 : vector<1x128xf32>
    %60 = vector.extract_strided_slice %43 {offsets = [0, 256], sizes = [1, 128], strides = [1, 1]} : vector<1x384xf32> to vector<1x128xf32>
    %61 = vector.extract_strided_slice %42 {offsets = [0, 256], sizes = [1, 128], strides = [1, 1]} : vector<1x384xf32> to vector<1x128xf32>
    %62 = arith.mulf %51, %61 : vector<1x128xf32>
    %63 = arith.addf %60, %62 : vector<1x128xf32>
    %64 = math.tanh %63 : vector<1x128xf32>
    %cst_23 = arith.constant 1.000000e+00 : f32
    %65 = vector.broadcast %cst_23 : f32 to vector<1x128xf32>
    %66 = arith.subf %65, %59 : vector<1x128xf32>
    %67 = arith.mulf %66, %64 : vector<1x128xf32>
    %68 = arith.mulf %59, %39 : vector<1x128xf32>
    %69 = arith.addf %67, %68 : vector<1x128xf32>
    %c1 = arith.constant 1 : index
    %c0_24 = arith.constant 0 : index
    %70 = vector.load %arg10[%c1, %c0_24] : memref<8x128xf32, #tpu.memory_space<vmem>>, vector<1x128xf32>
    tpu.vector_store %arg10[%c1, %c0_24], %69 {strides = array<i32>} : memref<8x128xf32, #tpu.memory_space<vmem>>, vector<1x128xf32>,
    %cst_25 = arith.constant dense<0.000000e+00> : vector<1x384xf32>
    %71 = tpu.matmul %69, %6, %cst_25 {dimension_numbers = #tpu.dot_dimension_numbers<[1], [0], [0], [1], [0, 0, 1, 1], [], []>} : vector<1x128xf32>, vector<128x384xf32>, vector<1x384xf32> -> vector<1x384xf32>
    %72 = arith.addf %71, %7 : vector<1x384xf32>
    %73 = vector.extract_strided_slice %5 {offsets = [2, 0], sizes = [1, 384], strides = [1, 1]} : vector<8x384xf32> to vector<1x384xf32>
    %74 = vector.extract_strided_slice %73 {offsets = [0, 0], sizes = [1, 128], strides = [1, 1]} : vector<1x384xf32> to vector<1x128xf32>
    %75 = vector.extract_strided_slice %72 {offsets = [0, 0], sizes = [1, 128], strides = [1, 1]} : vector<1x384xf32> to vector<1x128xf32>
    %76 = arith.addf %74, %75 : vector<1x128xf32>
    %77 = arith.negf %76 : vector<1x128xf32>
    %78 = math.exp %77 : vector<1x128xf32>
    %cst_26 = arith.constant 1.000000e+00 : f32
    %79 = vector.broadcast %cst_26 : f32 to vector<1x128xf32>
    %80 = arith.addf %79, %78 : vector<1x128xf32>
    %81 = arith.divf %79, %80 : vector<1x128xf32>
    %82 = vector.extract_strided_slice %73 {offsets = [0, 128], sizes = [1, 128], strides = [1, 1]} : vector<1x384xf32> to vector<1x128xf32>
    %83 = vector.extract_strided_slice %72 {offsets = [0, 128], sizes = [1, 128], strides = [1, 1]} : vector<1x384xf32> to vector<1x128xf32>
    %84 = arith.addf %82, %83 : vector<1x128xf32>
    %85 = arith.negf %84 : vector<1x128xf32>
    %86 = math.exp %85 : vector<1x128xf32>
    %cst_27 = arith.constant 1.000000e+00 : f32
    %87 = vector.broadcast %cst_27 : f32 to vector<1x128xf32>
    %88 = arith.addf %87, %86 : vector<1x128xf32>
    %89 = arith.divf %87, %88 : vector<1x128xf32>
    %90 = vector.extract_strided_slice %73 {offsets = [0, 256], sizes = [1, 128], strides = [1, 1]} : vector<1x384xf32> to vector<1x128xf32>
    %91 = vector.extract_strided_slice %72 {offsets = [0, 256], sizes = [1, 128], strides = [1, 1]} : vector<1x384xf32> to vector<1x128xf32>
    %92 = arith.mulf %81, %91 : vector<1x128xf32>
    %93 = arith.addf %90, %92 : vector<1x128xf32>
    %94 = math.tanh %93 : vector<1x128xf32>
    %cst_28 = arith.constant 1.000000e+00 : f32
    %95 = vector.broadcast %cst_28 : f32 to vector<1x128xf32>
    %96 = arith.subf %95, %89 : vector<1x128xf32>
    %97 = arith.mulf %96, %94 : vector<1x128xf32>
    %98 = arith.mulf %89, %69 : vector<1x128xf32>
    %99 = arith.addf %97, %98 : vector<1x128xf32>
    %c2 = arith.constant 2 : index
    %c0_29 = arith.constant 0 : index
    %100 = vector.load %arg10[%c2, %c0_29] : memref<8x128xf32, #tpu.memory_space<vmem>>, vector<1x128xf32>
    tpu.vector_store %arg10[%c2, %c0_29], %99 {strides = array<i32>} : memref<8x128xf32, #tpu.memory_space<vmem>>, vector<1x128xf32>,
    %cst_30 = arith.constant dense<0.000000e+00> : vector<1x384xf32>
    %101 = tpu.matmul %99, %6, %cst_30 {dimension_numbers = #tpu.dot_dimension_numbers<[1], [0], [0], [1], [0, 0, 1, 1], [], []>} : vector<1x128xf32>, vector<128x384xf32>, vector<1x384xf32> -> vector<1x384xf32>
    %102 = arith.addf %101, %7 : vector<1x384xf32>
    %103 = vector.extract_strided_slice %5 {offsets = [3, 0], sizes = [1, 384], strides = [1, 1]} : vector<8x384xf32> to vector<1x384xf32>
    %104 = vector.extract_strided_slice %103 {offsets = [0, 0], sizes = [1, 128], strides = [1, 1]} : vector<1x384xf32> to vector<1x128xf32>
    %105 = vector.extract_strided_slice %102 {offsets = [0, 0], sizes = [1, 128], strides = [1, 1]} : vector<1x384xf32> to vector<1x128xf32>
    %106 = arith.addf %104, %105 : vector<1x128xf32>
    %107 = arith.negf %106 : vector<1x128xf32>
    %108 = math.exp %107 : vector<1x128xf32>
    %cst_31 = arith.constant 1.000000e+00 : f32
    %109 = vector.broadcast %cst_31 : f32 to vector<1x128xf32>
    %110 = arith.addf %109, %108 : vector<1x128xf32>
    %111 = arith.divf %109, %110 : vector<1x128xf32>
    %112 = vector.extract_strided_slice %103 {offsets = [0, 128], sizes = [1, 128], strides = [1, 1]} : vector<1x384xf32> to vector<1x128xf32>
    %113 = vector.extract_strided_slice %102 {offsets = [0, 128], sizes = [1, 128], strides = [1, 1]} : vector<1x384xf32> to vector<1x128xf32>
    %114 = arith.addf %112, %113 : vector<1x128xf32>
    %115 = arith.negf %114 : vector<1x128xf32>
    %116 = math.exp %115 : vector<1x128xf32>
    %cst_32 = arith.constant 1.000000e+00 : f32
    %117 = vector.broadcast %cst_32 : f32 to vector<1x128xf32>
    %118 = arith.addf %117, %116 : vector<1x128xf32>
    %119 = arith.divf %117, %118 : vector<1x128xf32>
    %120 = vector.extract_strided_slice %103 {offsets = [0, 256], sizes = [1, 128], strides = [1, 1]} : vector<1x384xf32> to vector<1x128xf32>
    %121 = vector.extract_strided_slice %102 {offsets = [0, 256], sizes = [1, 128], strides = [1, 1]} : vector<1x384xf32> to vector<1x128xf32>
    %122 = arith.mulf %111, %121 : vector<1x128xf32>
    %123 = arith.addf %120, %122 : vector<1x128xf32>
    %124 = math.tanh %123 : vector<1x128xf32>
    %cst_33 = arith.constant 1.000000e+00 : f32
    %125 = vector.broadcast %cst_33 : f32 to vector<1x128xf32>
    %126 = arith.subf %125, %119 : vector<1x128xf32>
    %127 = arith.mulf %126, %124 : vector<1x128xf32>
    %128 = arith.mulf %119, %99 : vector<1x128xf32>
    %129 = arith.addf %127, %128 : vector<1x128xf32>
    %c3 = arith.constant 3 : index
    %c0_34 = arith.constant 0 : index
    %130 = vector.load %arg10[%c3, %c0_34] : memref<8x128xf32, #tpu.memory_space<vmem>>, vector<1x128xf32>
    tpu.vector_store %arg10[%c3, %c0_34], %129 {strides = array<i32>} : memref<8x128xf32, #tpu.memory_space<vmem>>, vector<1x128xf32>,
    %cst_35 = arith.constant dense<0.000000e+00> : vector<1x384xf32>
    %131 = tpu.matmul %129, %6, %cst_35 {dimension_numbers = #tpu.dot_dimension_numbers<[1], [0], [0], [1], [0, 0, 1, 1], [], []>} : vector<1x128xf32>, vector<128x384xf32>, vector<1x384xf32> -> vector<1x384xf32>
    %132 = arith.addf %131, %7 : vector<1x384xf32>
    %133 = vector.extract_strided_slice %5 {offsets = [4, 0], sizes = [1, 384], strides = [1, 1]} : vector<8x384xf32> to vector<1x384xf32>
    %134 = vector.extract_strided_slice %133 {offsets = [0, 0], sizes = [1, 128], strides = [1, 1]} : vector<1x384xf32> to vector<1x128xf32>
    %135 = vector.extract_strided_slice %132 {offsets = [0, 0], sizes = [1, 128], strides = [1, 1]} : vector<1x384xf32> to vector<1x128xf32>
    %136 = arith.addf %134, %135 : vector<1x128xf32>
    %137 = arith.negf %136 : vector<1x128xf32>
    %138 = math.exp %137 : vector<1x128xf32>
    %cst_36 = arith.constant 1.000000e+00 : f32
    %139 = vector.broadcast %cst_36 : f32 to vector<1x128xf32>
    %140 = arith.addf %139, %138 : vector<1x128xf32>
    %141 = arith.divf %139, %140 : vector<1x128xf32>
    %142 = vector.extract_strided_slice %133 {offsets = [0, 128], sizes = [1, 128], strides = [1, 1]} : vector<1x384xf32> to vector<1x128xf32>
    %143 = vector.extract_strided_slice %132 {offsets = [0, 128], sizes = [1, 128], strides = [1, 1]} : vector<1x384xf32> to vector<1x128xf32>
    %144 = arith.addf %142, %143 : vector<1x128xf32>
    %145 = arith.negf %144 : vector<1x128xf32>
    %146 = math.exp %145 : vector<1x128xf32>
    %cst_37 = arith.constant 1.000000e+00 : f32
    %147 = vector.broadcast %cst_37 : f32 to vector<1x128xf32>
    %148 = arith.addf %147, %146 : vector<1x128xf32>
    %149 = arith.divf %147, %148 : vector<1x128xf32>
    %150 = vector.extract_strided_slice %133 {offsets = [0, 256], sizes = [1, 128], strides = [1, 1]} : vector<1x384xf32> to vector<1x128xf32>
    %151 = vector.extract_strided_slice %132 {offsets = [0, 256], sizes = [1, 128], strides = [1, 1]} : vector<1x384xf32> to vector<1x128xf32>
    %152 = arith.mulf %141, %151 : vector<1x128xf32>
    %153 = arith.addf %150, %152 : vector<1x128xf32>
    %154 = math.tanh %153 : vector<1x128xf32>
    %cst_38 = arith.constant 1.000000e+00 : f32
    %155 = vector.broadcast %cst_38 : f32 to vector<1x128xf32>
    %156 = arith.subf %155, %149 : vector<1x128xf32>
    %157 = arith.mulf %156, %154 : vector<1x128xf32>
    %158 = arith.mulf %149, %129 : vector<1x128xf32>
    %159 = arith.addf %157, %158 : vector<1x128xf32>
    %c4 = arith.constant 4 : index
    %c0_39 = arith.constant 0 : index
    %160 = vector.load %arg10[%c4, %c0_39] : memref<8x128xf32, #tpu.memory_space<vmem>>, vector<1x128xf32>
    tpu.vector_store %arg10[%c4, %c0_39], %159 {strides = array<i32>} : memref<8x128xf32, #tpu.memory_space<vmem>>, vector<1x128xf32>,
    %cst_40 = arith.constant dense<0.000000e+00> : vector<1x384xf32>
    %161 = tpu.matmul %159, %6, %cst_40 {dimension_numbers = #tpu.dot_dimension_numbers<[1], [0], [0], [1], [0, 0, 1, 1], [], []>} : vector<1x128xf32>, vector<128x384xf32>, vector<1x384xf32> -> vector<1x384xf32>
    %162 = arith.addf %161, %7 : vector<1x384xf32>
    %163 = vector.extract_strided_slice %5 {offsets = [5, 0], sizes = [1, 384], strides = [1, 1]} : vector<8x384xf32> to vector<1x384xf32>
    %164 = vector.extract_strided_slice %163 {offsets = [0, 0], sizes = [1, 128], strides = [1, 1]} : vector<1x384xf32> to vector<1x128xf32>
    %165 = vector.extract_strided_slice %162 {offsets = [0, 0], sizes = [1, 128], strides = [1, 1]} : vector<1x384xf32> to vector<1x128xf32>
    %166 = arith.addf %164, %165 : vector<1x128xf32>
    %167 = arith.negf %166 : vector<1x128xf32>
    %168 = math.exp %167 : vector<1x128xf32>
    %cst_41 = arith.constant 1.000000e+00 : f32
    %169 = vector.broadcast %cst_41 : f32 to vector<1x128xf32>
    %170 = arith.addf %169, %168 : vector<1x128xf32>
    %171 = arith.divf %169, %170 : vector<1x128xf32>
    %172 = vector.extract_strided_slice %163 {offsets = [0, 128], sizes = [1, 128], strides = [1, 1]} : vector<1x384xf32> to vector<1x128xf32>
    %173 = vector.extract_strided_slice %162 {offsets = [0, 128], sizes = [1, 128], strides = [1, 1]} : vector<1x384xf32> to vector<1x128xf32>
    %174 = arith.addf %172, %173 : vector<1x128xf32>
    %175 = arith.negf %174 : vector<1x128xf32>
    %176 = math.exp %175 : vector<1x128xf32>
    %cst_42 = arith.constant 1.000000e+00 : f32
    %177 = vector.broadcast %cst_42 : f32 to vector<1x128xf32>
    %178 = arith.addf %177, %176 : vector<1x128xf32>
    %179 = arith.divf %177, %178 : vector<1x128xf32>
    %180 = vector.extract_strided_slice %163 {offsets = [0, 256], sizes = [1, 128], strides = [1, 1]} : vector<1x384xf32> to vector<1x128xf32>
    %181 = vector.extract_strided_slice %162 {offsets = [0, 256], sizes = [1, 128], strides = [1, 1]} : vector<1x384xf32> to vector<1x128xf32>
    %182 = arith.mulf %171, %181 : vector<1x128xf32>
    %183 = arith.addf %180, %182 : vector<1x128xf32>
    %184 = math.tanh %183 : vector<1x128xf32>
    %cst_43 = arith.constant 1.000000e+00 : f32
    %185 = vector.broadcast %cst_43 : f32 to vector<1x128xf32>
    %186 = arith.subf %185, %179 : vector<1x128xf32>
    %187 = arith.mulf %186, %184 : vector<1x128xf32>
    %188 = arith.mulf %179, %159 : vector<1x128xf32>
    %189 = arith.addf %187, %188 : vector<1x128xf32>
    %c5 = arith.constant 5 : index
    %c0_44 = arith.constant 0 : index
    %190 = vector.load %arg10[%c5, %c0_44] : memref<8x128xf32, #tpu.memory_space<vmem>>, vector<1x128xf32>
    tpu.vector_store %arg10[%c5, %c0_44], %189 {strides = array<i32>} : memref<8x128xf32, #tpu.memory_space<vmem>>, vector<1x128xf32>,
    %c0_45 = arith.constant 0 : index
    %c0_46 = arith.constant 0 : index
    %191 = vector.load %arg9[%c0_45, %c0_46] : memref<1x128xf32, #tpu.memory_space<vmem>>, vector<1x128xf32>
    tpu.vector_store %arg9[%c0_45, %c0_46], %189 {strides = array<i32>} : memref<1x128xf32, #tpu.memory_space<vmem>>, vector<1x128xf32>,
    %c0_47 = arith.constant 0 : index
    %c0_48 = arith.constant 0 : index
    %192 = vector.load %arg10[%c0_47, %c0_48] : memref<8x128xf32, #tpu.memory_space<vmem>>, vector<8x128xf32>
    %c0_49 = arith.constant 0 : index
    %c0_50 = arith.constant 0 : index
    %193 = vector.load %arg6[%c0_49, %c0_50] : memref<128x128xf32, #tpu.memory_space<vmem>>, vector<128x128xf32>
    %cst_51 = arith.constant dense<0.000000e+00> : vector<8x128xf32>
    %194 = tpu.matmul %192, %193, %cst_51 {dimension_numbers = #tpu.dot_dimension_numbers<[1], [0], [0], [1], [0, 0, 1, 1], [], []>} : vector<8x128xf32>, vector<128x128xf32>, vector<8x128xf32> -> vector<8x128xf32>
    %c0_52 = arith.constant 0 : index
    %c0_53 = arith.constant 0 : index
    %195 = vector.load %arg7[%c0_52, %c0_53] : memref<1x128xf32, #tpu.memory_space<vmem>>, vector<1x128xf32>
    %196 = vector.broadcast %195 : vector<1x128xf32> to vector<8x128xf32>
    %197 = arith.addf %194, %196 : vector<8x128xf32>
    %c0_54 = arith.constant 0 : index
    %c0_55 = arith.constant 0 : index
    %198 = vector.load %arg8[%c0_54, %c0_55] : memref<8x128xf32, #tpu.memory_space<vmem>>, vector<8x128xf32>
    tpu.vector_store %arg8[%c0_54, %c0_55], %197 {strides = array<i32>} : memref<8x128xf32, #tpu.memory_space<vmem>>, vector<8x128xf32>,
    return
  }
}

</mosaic_0001>

<bundles_post_ra>
// kernel: controller_rollout.1
= control target key start
LH: loop header
LB: loop body
LE: loop exit
PB: predicated region body
PF: predicated region fallthrough
CT: control target
= control target key end

     0   :  { %15 = vsyncpa [#allocation4], 0  ;;  %s2799_s0 = inlined_call_operand.vmem [shape: f32[8,128], index: 0, kind: input, shape index: {}]   ;;  %s2800_s1 = inlined_call_operand.vmem [shape: f32[1,128], index: 1, kind: input, shape index: {}]   ;;  %s2801_s2 = inlined_call_operand.hbm [shape: f32[128,384], index: 2, kind: input, shape index: {}]   ;;  %s2802_s3 = inlined_call_operand.vmem [shape: f32[1,384], index: 3, kind: input, shape index: {}]   ;;  %s2803_s4 = inlined_call_operand.hbm [shape: f32[128,384], index: 4, kind: input, shape index: {}]   ;;  %s2804_s5 = inlined_call_operand.vmem [shape: f32[1,384], index: 5, kind: input, shape index: {}]   ;;  %s2805_s6 = inlined_call_operand.hbm [shape: f32[128,128], index: 6, kind: input, shape index: {}]   ;;  %s2806_s7 = inlined_call_operand.vmem [shape: f32[1,128], index: 7, kind: input, shape index: {}]   ;;  %s2807_s8 = inlined_call_operand.hbm [shape: f32[8,128], index: 8, kind: output, shape index: {0}]   ;;  %s2808_s9 = inlined_call_operand.vmem [shape: f32[1,128], index: 9, kind: output, shape index: {1}]  }
   0x1   :  { %16 = vsyncpa [#allocation7], 0 }
   0x2   :  { %17 = vsyncpa [#allocation5], 0  ;;  %s2129_s30 = smov [#allocation6]   ;;  %s2130_s11 = smov [#allocation3]  }
   0x3   :  { %s41_s10 = sshll.u32 %s2129_s30, 4  ;;  %s27_s12 = sshll.u32 %s2130_s11, 4  ;;  %s42_s10 = int_to_ptr.vmem [resolvable:$true] %s41_s10  ;;  %s28_s12 = int_to_ptr.vmem [resolvable:$true] %s27_s12 }
   0x4   :  { %s2051_s13 = scalar_lea.vmem %s42_s10, 6144  ;;  %p2056_p1 = scmp.lt.s32.totalorder %s42_s10, %s42_s10 }
   0x5   :  { %p2052_p0 = scmp.ne.s32.totalorder %s42_s10, %s2051_s13  ;;  %p2057_p2 = scmp.lt.s32.totalorder %s2051_s13, %s2051_s13 }
   0x7   :  { %p2058_p3 = por %p2057_p2, %p2056_p1 }
   0x9   :  { %p2059_p4 = pnand %p2058_p3, %p2052_p0 }
   0xb   :  { %2062 = shalt.err (!%p2059_p4)
}
   0xc   :  { %s2131_s14 = smov 384   ;;  %s2132_s15 = smov 24  }
   0xd   :  { %47 = dma.hbm_to_vmem [thread:$0]  %s2803_s4, 6144, %s42_s10, [#allocation7], %s2131_s14, %s2131_s14, %s2132_s15  }
   0xe   :  { %s2071_s18 = scalar_lea.vmem %s28_s12, 6144  ;;  %p2076_p6 = scmp.lt.s32.totalorder %s28_s12, %s28_s12 }
   0xf   :  { %p2072_p5 = scmp.ne.s32.totalorder %s28_s12, %s2071_s18  ;;  %p2077_p7 = scmp.lt.s32.totalorder %s2071_s18, %s2071_s18 }
  0x11   :  { %p2078_p8 = por %p2077_p7, %p2076_p6 }
  0x13   :  { %p2079_p9 = pnand %p2078_p8, %p2072_p5 }
  0x15   :  { %2082 = shalt.err (!%p2079_p9)
}
  0x16   :  { %33 = dma.hbm_to_vmem [thread:$0]  %s2801_s2, 6144, %s28_s12, [#allocation4], %s2131_s14, %s2131_s14, %s2132_s15  }
  0x17   :  { %s2133_s21 = smov [#allocation8]  }
  0x18   :  { %s55_s22 = sshll.u32 %s2133_s21, 4  ;;  %s56_s22 = int_to_ptr.vmem [resolvable:$true] %s55_s22 }
  0x19   :  { %s2091_s23 = scalar_lea.vmem %s56_s22, 2048  ;;  %p2096_p11 = scmp.lt.s32.totalorder %s56_s22, %s56_s22 }
  0x1a   :  { %p2092_p10 = scmp.ne.s32.totalorder %s56_s22, %s2091_s23  ;;  %p2097_p12 = scmp.lt.s32.totalorder %s2091_s23, %s2091_s23 }
  0x1c   :  { %p2098_p13 = por %p2097_p12, %p2096_p11 }
  0x1e   :  { %p2099_p0 = pnand %p2098_p13, %p2092_p10 }
  0x20   :  { %2102 = shalt.err (!%p2099_p0)
}
  0x21   :  { %s2134_s4 = smov 128   ;;  %s2135_s24 = smov 8  }
  0x22   :  { %61 = dma.hbm_to_vmem [thread:$0]  %s2805_s6, 2048, %s56_s22, [#allocation7], %s2134_s4, %s2134_s4, %s2135_s24  }
  0x23   :  { %2123 = dma.done.wait [#allocation4], 6144  }
  0x24   :  { %2124 = vsyncadd [#allocation4], 4294961152 }
  0x25   :  { %2125 = dma.done.wait [#allocation7], 8192  }
  0x26   :  { %2126 = vsyncadd [#allocation7], 4294959104  ;;  %v2809_v0 = vmov 0.0   ;;  %vm2137_vm0 = vmmov 0   ;;  %v120_v1 = vld [vmem:[#allocation3 + $0x170] sm:$0xff]  ;;  %v119_v2 = vld [vmem:[#allocation3 + $0x168] sm:$0xff] }
  0x27   :  { %203 = vmatprep.mubr.f32.mxu0 %v2809_v0  ;;  %329 = vst [vmem:[#allocation2] sm:$0xff] %v2809_v0  ;;  %1658 = vmatprep.subr.mxu1 %v2809_v0  ;;  %v117_v3 = vld [vmem:[#allocation3 + $0x158] sm:$0xff]  ;;  %v116_v4 = vld [vmem:[#allocation3 + $0x150] sm:$0xff]  ;;  %v114_v5 = vld [vmem:[#allocation3 + $0x140] sm:$0xff]  ;;  %s2138_s12 = smov [#allocation9]  }
  0x28   :  { %1690 = vmatprep.mubr.msk.f32.mxu1 %vm2137_vm0, %v2809_v0  ;;  %139 = vmatprep.subr.mxu0 %v120_v1  ;;  %v113_v6 = vld [vmem:[#allocation3 + $0x138] sm:$0xff]  ;;  %v111_v7 = vld [vmem:[#allocation3 + $0x128] sm:$0xff]  ;;  %v110_v8 = vld [vmem:[#allocation3 + $0x120] sm:$0xff]  ;;  %s1495_s13 = sshll.u32 %s2138_s12, 4  ;;  %s1496_s13 = int_to_ptr.vmem [resolvable:$true] %s1495_s13 }
  0x29   :  { %140 = vmatpush1.msra.mxu0 %v119_v2  ;;  %v108_v9 = vld [vmem:[#allocation3 + $0x110] sm:$0xff]  ;;  %v107_v10 = vld [vmem:[#allocation3 + $0x108] sm:$0xff]  ;;  %v105_v11 = vld [vmem:[#allocation3 + $0xf8] sm:$0xff]  ;;  %s2103_s14 = scalar_lea.vmem %s1496_s13, 128  ;;  %p2108_p2 = scmp.lt.s32.totalorder %s1496_s13, %s1496_s13 }
  0x2a   :  { %141 = vmatprep.subr.mxu0 %v117_v3  ;;  %v104_v12 = vld [vmem:[#allocation3 + $0xf0] sm:$0xff]  ;;  %v102_v13 = vld [vmem:[#allocation3 + $0xe0] sm:$0xff]  ;;  %v101_v14 = vld [vmem:[#allocation3 + $0xd8] sm:$0xff]  ;;  %p2104_p1 = scmp.ne.s32.totalorder %s1496_s13, %s2103_s14  ;;  %p2109_p3 = scmp.lt.s32.totalorder %s2103_s14, %s2103_s14 }
  0x2b   :  { %142 = vmatpush1.msra.mxu0 %v116_v4  ;;  %v121_v15 = vld [vmem:[#allocation3 + $0x178] sm:$0xff]  ;;  %v99_v16 = vld [vmem:[#allocation3 + $0xc8] sm:$0xff]  ;;  %v118_v17 = vld [vmem:[#allocation3 + $0x160] sm:$0xff] }
  0x2c   :  { %143 = vmatprep.subr.mxu0 %v114_v5  ;;  %1659 = vmatpush3.msra.mxu1 %v121_v15  ;;  %v98_v18 = vld [vmem:[#allocation3 + $0xc0] sm:$0xff]  ;;  %v115_v19 = vld [vmem:[#allocation3 + $0x148] sm:$0xff]  ;;  %v96_v20 = vld [vmem:[#allocation3 + $0xb0] sm:$0xff]  ;;  %p2110_p4 = por %p2109_p3, %p2108_p2 }
  0x2d   :  { %144 = vmatpush1.msra.mxu0 %v113_v6  ;;  %1660 = vmatprep.subr.mxu1 %v2809_v0  ;;  %v95_v21 = vld [vmem:[#allocation3 + $0xa8] sm:$0xff]  ;;  %v112_v22 = vld [vmem:[#allocation3 + $0x130] sm:$0xff]  ;;  %v93_v23 = vld [vmem:[#allocation3 + $0x98] sm:$0xff] }
  0x2e   :  { %145 = vmatprep.subr.mxu0 %v111_v7  ;;  %1661 = vmatpush3.msra.mxu1 %v118_v17  ;;  %v92_v24 = vld [vmem:[#allocation3 + $0x90] sm:$0xff]  ;;  %v109_v25 = vld [vmem:[#allocation3 + $0x118] sm:$0xff]  ;;  %v90_v26 = vld [vmem:[#allocation3 + $0x80] sm:$0xff]  ;;  %p2111_p5 = pnand %p2110_p4, %p2104_p1 }
  0x2f   :  { %146 = vmatpush1.msra.mxu0 %v110_v8  ;;  %1662 = vmatprep.subr.mxu1 %v2809_v0  ;;  %v89_v27 = vld [vmem:[#allocation3 + $0x78] sm:$0xff]  ;;  %v106_v28 = vld [vmem:[#allocation3 + $0x100] sm:$0xff]  ;;  %v87_v29 = vld [vmem:[#allocation3 + $0x68] sm:$0xff] }
  0x30   :  { %147 = vmatprep.subr.mxu0 %v108_v9  ;;  %1663 = vmatpush3.msra.mxu1 %v115_v19  ;;  %v86_v30 = vld [vmem:[#allocation3 + $0x60] sm:$0xff]  ;;  %v103_v31 = vld [vmem:[#allocation3 + $0xe8] sm:$0xff]  ;;  %v84_v32 = vld [vmem:[#allocation3 + $0x50] sm:$0xff] }
  0x31   :  { %148 = vmatpush1.msra.mxu0 %v107_v10  ;;  %1664 = vmatprep.subr.mxu1 %v2809_v0  ;;  %v83_v33 = vld [vmem:[#allocation3 + $0x48] sm:$0xff]  ;;  %v100_v34 = vld [vmem:[#allocation3 + $0xd0] sm:$0xff]  ;;  %v81_v35 = vld [vmem:[#allocation3 + $0x38] sm:$0xff] }
  0x32   :  { %149 = vmatprep.subr.mxu0 %v105_v11  ;;  %1665 = vmatpush3.msra.mxu1 %v112_v22  ;;  %v80_v36 = vld [vmem:[#allocation3 + $0x30] sm:$0xff]  ;;  %v97_v37 = vld [vmem:[#allocation3 + $0xb8] sm:$0xff]  ;;  %v78_v38 = vld [vmem:[#allocation3 + $0x20] sm:$0xff] }
  0x33   :  { %150 = vmatpush1.msra.mxu0 %v104_v12  ;;  %1666 = vmatprep.subr.mxu1 %v2809_v0  ;;  %v77_v39 = vld [vmem:[#allocation3 + $0x18] sm:$0xff]  ;;  %v94_v40 = vld [vmem:[#allocation3 + $0xa0] sm:$0xff]  ;;  %v75_v41 = vld [vmem:[#allocation3 + $0x8] sm:$0xff] }
  0x34   :  { %151 = vmatprep.subr.mxu0 %v102_v13  ;;  %1667 = vmatpush3.msra.mxu1 %v109_v25  ;;  %v74_v42 = vld [vmem:[#allocation3] sm:$0xff]  ;;  %v91_v43 = vld [vmem:[#allocation3 + $0x88] sm:$0xff]  ;;  %v73_v44 = vld [vmem:[%s2799_s0] sm:$0xff] }
  0x35   :  { %152 = vmatpush1.msra.mxu0 %v101_v14  ;;  %1668 = vmatprep.subr.mxu1 %v2809_v0  ;;  %v2215_v45 = vld [vmem:[#allocation6 + $0x170] sm:$0xff]  ;;  %v2217_v46 = vld [vmem:[#allocation6 + $0x168] sm:$0xff]  ;;  %v2220_v47 = vld [vmem:[#allocation6 + $0x158] sm:$0xff] }
  0x36   :  { %153 = vmatprep.subr.mxu0 %v99_v16  ;;  %1669 = vmatpush3.msra.mxu1 %v106_v28  ;;  %2829 = vst [vmem:[#allocation13_spill] sm:$0xff] %v2215_v45  ;;  %v88_v48 = vld [vmem:[#allocation3 + $0x70] sm:$0xff]  ;;  %v2226_v50 = vld [vmem:[#allocation6 + $0x140] sm:$0xff]  ;;  %v85_v51 = vld [vmem:[#allocation3 + $0x58] sm:$0xff] }
  0x37   :  { %154 = vmatpush1.msra.mxu0 %v98_v18  ;;  %1670 = vmatprep.subr.mxu1 %v2809_v0  ;;  %v2223_v49 = vld [vmem:[#allocation6 + $0x150] sm:$0xff]  ;;  %v2230_v52 = vld [vmem:[#allocation6 + $0x138] sm:$0xff]  ;;  %v2233_v53 = vld [vmem:[#allocation6 + $0x128] sm:$0xff] }
  0x38   :  { %155 = vmatprep.subr.mxu0 %v96_v20  ;;  %1671 = vmatpush3.msra.mxu1 %v103_v31  ;;  %v82_v54 = vld [vmem:[#allocation3 + $0x40] sm:$0xff]  ;;  %v2240_v56 = vld [vmem:[#allocation6 + $0x110] sm:$0xff]  ;;  %v79_v57 = vld [vmem:[#allocation3 + $0x28] sm:$0xff] }
  0x39   :  { %156 = vmatpush1.msra.mxu0 %v95_v21  ;;  %1672 = vmatprep.subr.mxu1 %v2809_v0  ;;  %v2237_v55 = vld [vmem:[#allocation6 + $0x120] sm:$0xff]  ;;  %v2244_v58 = vld [vmem:[#allocation6 + $0x108] sm:$0xff]  ;;  %v2247_v59 = vld [vmem:[#allocation6 + $0xf8] sm:$0xff] }
  0x3a   :  { %157 = vmatprep.subr.mxu0 %v93_v23  ;;  %1673 = vmatpush3.msra.mxu1 %v100_v34  ;;  %v76_v60 = vld [vmem:[#allocation3 + $0x10] sm:$0xff]  ;;  %v2254_v62 = vld [vmem:[#allocation6 + $0xe0] sm:$0xff]  ;;  %v2258_v63 = vld [vmem:[#allocation6 + $0xd8] sm:$0xff] }
  0x3b   :  { %158 = vmatpush1.msra.mxu0 %v92_v24  ;;  %1674 = vmatprep.subr.mxu1 %v2809_v0  ;;  %v2251_v61 = vld [vmem:[#allocation6 + $0xf0] sm:$0xff]  ;;  %v2261_v1 = vld [vmem:[#allocation6 + $0xc8] sm:$0xff]  ;;  %v2264_v2 = vld [vmem:[#allocation6 + $0x178] sm:$0xff] }
  0x3c   :  { %159 = vmatprep.subr.mxu0 %v90_v26  ;;  %1675 = vmatpush3.msra.mxu1 %v97_v37  ;;  %v2267_v3 = vld [vmem:[#allocation6 + $0xc0] sm:$0xff]  ;;  %v2271_v4 = vld [vmem:[#allocation6 + $0xb0] sm:$0xff]  ;;  %v2276_v6 = vld [vmem:[#allocation6 + $0xa8] sm:$0xff] }
  0x3d   :  { %160 = vmatpush1.msra.mxu0 %v89_v27  ;;  %1676 = vmatprep.subr.mxu1 %v2809_v0  ;;  %v2273_v5 = vld [vmem:[#allocation6 + $0x160] sm:$0xff]  ;;  %v2280_v7 = vld [vmem:[#allocation6 + $0x98] sm:$0xff]  ;;  %v2283_v8 = vld [vmem:[#allocation6 + $0x148] sm:$0xff] }
  0x3e   :  { %161 = vmatprep.subr.mxu0 %v87_v29  ;;  %1677 = vmatpush3.msra.mxu1 %v94_v40  ;;  %v2286_v9 = vld [vmem:[#allocation6 + $0x90] sm:$0xff]  ;;  %v2290_v10 = vld [vmem:[#allocation6 + $0x80] sm:$0xff]  ;;  %v2296_v12 = vld [vmem:[#allocation6 + $0x78] sm:$0xff] }
  0x3f   :  { %162 = vmatpush1.msra.mxu0 %v86_v30  ;;  %1678 = vmatprep.subr.mxu1 %v2809_v0  ;;  %v2293_v11 = vld [vmem:[#allocation6 + $0x130] sm:$0xff]  ;;  %v2300_v13 = vld [vmem:[#allocation6 + $0x68] sm:$0xff]  ;;  %v2303_v14 = vld [vmem:[#allocation6 + $0x118] sm:$0xff] }
  0x40   :  { %163 = vmatprep.subr.mxu0 %v84_v32  ;;  %1679 = vmatpush3.msra.mxu1 %v91_v43  ;;  %v2306_v15 = vld [vmem:[#allocation6 + $0x60] sm:$0xff]  ;;  %v2310_v16 = vld [vmem:[#allocation6 + $0x50] sm:$0xff]  ;;  %v2316_v18 = vld [vmem:[#allocation6 + $0x48] sm:$0xff] }
  0x41   :  { %164 = vmatpush1.msra.mxu0 %v83_v33  ;;  %1680 = vmatprep.subr.mxu1 %v2809_v0  ;;  %v2313_v17 = vld [vmem:[#allocation6 + $0x100] sm:$0xff]  ;;  %v2320_v19 = vld [vmem:[#allocation6 + $0x38] sm:$0xff]  ;;  %v2323_v20 = vld [vmem:[#allocation6 + $0xe8] sm:$0xff] }
  0x42   :  { %165 = vmatprep.subr.mxu0 %v81_v35  ;;  %1681 = vmatpush3.msra.mxu1 %v88_v48  ;;  %v2326_v21 = vld [vmem:[#allocation6 + $0x30] sm:$0xff]  ;;  %v2330_v22 = vld [vmem:[#allocation6 + $0x20] sm:$0xff]  ;;  %v2336_v24 = vld [vmem:[#allocation6 + $0x18] sm:$0xff] }
  0x43   :  { %166 = vmatpush1.msra.mxu0 %v80_v36  ;;  %1682 = vmatprep.subr.mxu1 %v2809_v0  ;;  %2830 = vst [vmem:[#allocation14_spill] sm:$0xff] %v2330_v22  ;;  %v2333_v23 = vld [vmem:[#allocation6 + $0xd0] sm:$0xff]  ;;  %2831 = vst [vmem:[#allocation15_spill] sm:$0xff] %v2336_v24  ;;  %v2340_v25 = vld [vmem:[#allocation6 + $0x8] sm:$0xff] }
  0x44   :  { %167 = vmatprep.subr.mxu0 %v78_v38  ;;  %1683 = vmatpush3.msra.mxu1 %v85_v51  ;;  %2832 = vst [vmem:[#allocation16_spill] sm:$0xff] %v2340_v25  ;;  %v2343_v26 = vld [vmem:[#allocation6 + $0xb8] sm:$0xff]  ;;  %v2346_v27 = vld [vmem:[#allocation6] sm:$0xff]  ;;  %v2362_v30 = vld [vmem:[#allocation6 + $0x88] sm:$0xff]  ;;  %v124_v38 = vlaneseq }
  0x45   :  { %168 = vmatpush1.msra.mxu0 %v77_v39  ;;  %1684 = vmatprep.subr.mxu1 %v2809_v0  ;;  %2833 = vst [vmem:[#allocation17_spill] sm:$0xff] %v2346_v27  ;;  %v2353_v28 = vld [vmem:[%s2800_s1] sm:$0x1]  ;;  %v2356_v29 = vld [vmem:[#allocation6 + $0xa0] sm:$0xff]  ;;  %v2367_v31 = vld [vmem:[#allocation6 + $0x70] sm:$0xff] }
  0x46   :  { %169 = vmatprep.subr.mxu0 %v75_v41  ;;  %1685 = vmatpush3.msra.mxu1 %v82_v54  ;;  %v2374_v32 = vld [vmem:[#allocation6 + $0x58] sm:$0xff]  ;;  %v2380_v33 = vld [vmem:[#allocation6 + $0x40] sm:$0xff]  ;;  %v2386_v34 = vld [vmem:[#allocation6 + $0x28] sm:$0xff]  ;;  %v125_v39 = vshrl.u32 %v124_v38, 7 }
  0x47   :  { %170 = vmatpush1.msra.mxu0 %v74_v42  ;;  %1686 = vmatprep.subr.mxu1 %v2809_v0  ;;  %2834 = vst [vmem:[#allocation18_spill] sm:$0xff] %v2380_v33  ;;  %2835 = vst [vmem:[#allocation19_spill] sm:$0xff] %v2386_v34  ;;  %v2392_v35 = vld [vmem:[#allocation6 + $0x10] sm:$0xff]  ;;  %v122_v41 = vld [vmem:[%s2802_s3] sm:$0x7] }
  0x48   :  { %204 = vmatmul.mubr.f32.vlgmr.msra.gmra.mxu0 %v73_v44  ;;  %347 = vmatprep.subr.mxu0 %v2215_v45  ;;  %2836 = vst [vmem:[#allocation20_spill] sm:$0xff] %v2392_v35  ;;  %v126_v40 = vsub.s32 0, %v125_v39  ;;  %v328_v43 = vld [vmem:[%s2804_s5] sm:$0x7]  ;;  %v130_v54 = vsub.s32 1, %v125_v39 }
  0x49   :  { %348 = vmatpush1.msra.mxu0 %v2217_v46  ;;  %1687 = vmatpush3.msra.mxu1 %v79_v57 }
  0x4a   :  { %349 = vmatprep.subr.mxu0 %v2220_v47  ;;  %1688 = vmatprep.subr.mxu1 %v2809_v0  ;;  %v2466_v48 = vrot.slane %v328_v43, %v126_v40 }
  0x4b   :  { %350 = vmatpush1.msra.mxu0 %v2223_v49  ;;  %1689 = vmatpush3.msra.mxu1 %v76_v60 }
  0x4c   :  { %351 = vmatprep.subr.mxu0 %v2226_v50  ;;  %411 = vmatprep.mubr.f32.mxu0 %v2809_v0  ;;  %2837 = vst [vmem:[#allocation21_spill] sm:$0xff] %v2466_v48 }
  0x4d   :  { %352 = vmatpush1.msra.mxu0 %v2230_v52  ;;  %1693 = vmatprep.subr.mxu1 %v2809_v0 }
  0x4e   :  { %353 = vmatprep.subr.mxu0 %v2233_v53  ;;  %1691 = vmatmul.mubr.f32.vlgmr.msra.gmra.mxu1 %v73_v44  ;;  %v127_v44 = vrot.slane %v122_v41, %v126_v40 }
  0x4f   :  { %354 = vmatpush1.msra.mxu0 %v2237_v55  ;;  %1694 = vmatpush3.msra.mxu1 %v2264_v2 }
  0x50   :  { %355 = vmatprep.subr.mxu0 %v2240_v56  ;;  %1695 = vmatprep.subr.mxu1 %v2809_v0 }
  0x51   :  { %356 = vmatpush1.msra.mxu0 %v2244_v58  ;;  %1696 = vmatpush3.msra.mxu1 %v2273_v5 }
  0x52   :  { %357 = vmatprep.subr.mxu0 %v2247_v59  ;;  %1697 = vmatprep.subr.mxu1 %v2809_v0 }
  0x53   :  { %358 = vmatpush1.msra.mxu0 %v2251_v61  ;;  %1698 = vmatpush3.msra.mxu1 %v2283_v8 }
  0x54   :  { %359 = vmatprep.subr.mxu0 %v2254_v62  ;;  %1699 = vmatprep.subr.mxu1 %v2809_v0 }
  0x55   :  { %360 = vmatpush1.msra.mxu0 %v2258_v63  ;;  %1700 = vmatpush3.msra.mxu1 %v2293_v11 }
  0x56   :  { %361 = vmatprep.subr.mxu0 %v2261_v1  ;;  %1701 = vmatprep.subr.mxu1 %v2809_v0 }
  0x57   :  { %362 = vmatpush1.msra.mxu0 %v2267_v3  ;;  %1702 = vmatpush3.msra.mxu1 %v2303_v14 }
  0x58   :  { %363 = vmatprep.subr.mxu0 %v2271_v4  ;;  %1703 = vmatprep.subr.mxu1 %v2809_v0 }
  0x59   :  { %364 = vmatpush1.msra.mxu0 %v2276_v6  ;;  %1704 = vmatpush3.msra.mxu1 %v2313_v17 }
  0x5a   :  { %365 = vmatprep.subr.mxu0 %v2280_v7  ;;  %1705 = vmatprep.subr.mxu1 %v2809_v0 }
  0x5b   :  { %366 = vmatpush1.msra.mxu0 %v2286_v9  ;;  %1706 = vmatpush3.msra.mxu1 %v2323_v20 }
  0x5c   :  { %367 = vmatprep.subr.mxu0 %v2290_v10  ;;  %1707 = vmatprep.subr.mxu1 %v2809_v0 }
  0x5d   :  { %368 = vmatpush1.msra.mxu0 %v2296_v12  ;;  %1708 = vmatpush3.msra.mxu1 %v2333_v23 }
  0x5e   :  { %369 = vmatprep.subr.mxu0 %v2300_v13  ;;  %1709 = vmatprep.subr.mxu1 %v2809_v0 }
  0x5f   :  { %370 = vmatpush1.msra.mxu0 %v2306_v15  ;;  %1710 = vmatpush3.msra.mxu1 %v2343_v26 }
  0x60   :  { %371 = vmatprep.subr.mxu0 %v2310_v16  ;;  %1711 = vmatprep.subr.mxu1 %v2809_v0 }
  0x61   :  { %372 = vmatpush1.msra.mxu0 %v2316_v18  ;;  %1712 = vmatpush3.msra.mxu1 %v2356_v29 }
  0x62   :  { %373 = vmatprep.subr.mxu0 %v2320_v19  ;;  %1713 = vmatprep.subr.mxu1 %v2809_v0 }
  0x63   :  { %374 = vmatpush1.msra.mxu0 %v2326_v21  ;;  %1725 = vmatprep.mubr.msk.f32.mxu1 %vm2137_vm0, %v2809_v0 }
  0x64   :  { %375 = vmatprep.subr.mxu0 %v2330_v22  ;;  %1714 = vmatpush3.msra.mxu1 %v2362_v30 }
  0x65   :  { %376 = vmatpush1.msra.mxu0 %v2336_v24  ;;  %1715 = vmatprep.subr.mxu1 %v2809_v0 }
  0x66   :  { %377 = vmatprep.subr.mxu0 %v2340_v25  ;;  %1716 = vmatpush3.msra.mxu1 %v2367_v31 }
  0x67   :  { %378 = vmatpush1.msra.mxu0 %v2346_v27  ;;  %1717 = vmatprep.subr.mxu1 %v2809_v0 }
  0x68   :  { %412 = vmatmul.mubr.f32.vlgmr.msra.gmra.mxu0 %v2353_v28  ;;  %510 = vmatprep.subr.mxu0 %v2215_v45 }
  0x69   :  { %511 = vmatpush1.msra.mxu0 %v2217_v46  ;;  %1718 = vmatpush3.msra.mxu1 %v2374_v32 }
  0x6a   :  { %512 = vmatprep.subr.mxu0 %v2220_v47  ;;  %1719 = vmatprep.subr.mxu1 %v2809_v0 }
  0x6b   :  { %513 = vmatpush1.msra.mxu0 %v2223_v49  ;;  %1720 = vmatpush3.msra.mxu1 %v2380_v33 }
  0x6c   :  { %514 = vmatprep.subr.mxu0 %v2226_v50  ;;  %1721 = vmatprep.subr.mxu1 %v2809_v0 }
  0x6d   :  { %515 = vmatpush1.msra.mxu0 %v2230_v52  ;;  %1722 = vmatpush3.msra.mxu1 %v2386_v34 }
  0x6e   :  { %516 = vmatprep.subr.mxu0 %v2233_v53  ;;  %1723 = vmatprep.subr.mxu1 %v2809_v0 }
  0x6f   :  { %517 = vmatpush1.msra.mxu0 %v2237_v55  ;;  %1724 = vmatpush3.msra.mxu1 %v2392_v35 }
  0x70   :  { %518 = vmatprep.subr.mxu0 %v2240_v56  ;;  %1726 = vmatmul.mubr.f32.vlgmr.msra.gmra.mxu1 %v2353_v28 }
  0x71   :  { %519 = vmatpush1.msra.mxu0 %v2244_v58  ;;  %1728 = vmatprep.subr.mxu1 %v2809_v0 }
  0x72   :  { %520 = vmatprep.subr.mxu0 %v2247_v59  ;;  %1729 = vmatpush3.msra.mxu1 %v2264_v2 }
  0x73   :  { %521 = vmatpush1.msra.mxu0 %v2251_v61  ;;  %1730 = vmatprep.subr.mxu1 %v2809_v0 }
  0x74   :  { %522 = vmatprep.subr.mxu0 %v2254_v62  ;;  %1731 = vmatpush3.msra.mxu1 %v2273_v5 }
  0x75   :  { %523 = vmatpush1.msra.mxu0 %v2258_v63  ;;  %1732 = vmatprep.subr.mxu1 %v2809_v0 }
  0x76   :  { %524 = vmatprep.subr.mxu0 %v2261_v1  ;;  %1733 = vmatpush3.msra.mxu1 %v2283_v8 }
  0x77   :  { %525 = vmatpush1.msra.mxu0 %v2267_v3  ;;  %1734 = vmatprep.subr.mxu1 %v2809_v0 }
  0x78   :  { %526 = vmatprep.subr.mxu0 %v2271_v4  ;;  %1735 = vmatpush3.msra.mxu1 %v2293_v11 }
  0x79   :  { %527 = vmatpush1.msra.mxu0 %v2276_v6  ;;  %1736 = vmatprep.subr.mxu1 %v2809_v0 }
  0x7a   :  { %528 = vmatprep.subr.mxu0 %v2280_v7  ;;  %1737 = vmatpush3.msra.mxu1 %v2303_v14 }
  0x7b   :  { %529 = vmatpush1.msra.mxu0 %v2286_v9  ;;  %1738 = vmatprep.subr.mxu1 %v2809_v0 }
  0x7c   :  { %530 = vmatprep.subr.mxu0 %v2290_v10  ;;  %1739 = vmatpush3.msra.mxu1 %v2313_v17 }
  0x7d   :  { %531 = vmatpush1.msra.mxu0 %v2296_v12  ;;  %1740 = vmatprep.subr.mxu1 %v2809_v0 }
  0x7e   :  { %532 = vmatprep.subr.mxu0 %v2300_v13  ;;  %1741 = vmatpush3.msra.mxu1 %v2323_v20 }
  0x7f   :  { %533 = vmatpush1.msra.mxu0 %v2306_v15  ;;  %1742 = vmatprep.subr.mxu1 %v2809_v0 }
  0x80   :  { %534 = vmatprep.subr.mxu0 %v2310_v16  ;;  %1743 = vmatpush3.msra.mxu1 %v2333_v23 }
  0x81   :  { %535 = vmatpush1.msra.mxu0 %v2316_v18  ;;  %1744 = vmatprep.subr.mxu1 %v2809_v0 }
  0x82   :  { %536 = vmatprep.subr.mxu0 %v2320_v19  ;;  %1745 = vmatpush3.msra.mxu1 %v2343_v26 }
  0x83   :  { %537 = vmatpush1.msra.mxu0 %v2326_v21  ;;  %1746 = vmatprep.subr.mxu1 %v2809_v0 }
  0x84   :  { %538 = vmatprep.subr.mxu0 %v2330_v22  ;;  %1747 = vmatpush3.msra.mxu1 %v2356_v29 }
  0x85   :  { %539 = vmatpush1.msra.mxu0 %v2336_v24  ;;  %1748 = vmatprep.subr.mxu1 %v2809_v0 }
  0x86   :  { %540 = vmatprep.subr.mxu0 %v2340_v25  ;;  %1749 = vmatpush3.msra.mxu1 %v2362_v30 }
  0x87   :  { %541 = vmatpush1.msra.mxu0 %v2346_v27  ;;  %1750 = vmatprep.subr.mxu1 %v2809_v0 }
  0x88   :  { %574 = vmatprep.mubr.f32.mxu0 %v2809_v0  ;;  %1751 = vmatpush3.msra.mxu1 %v2367_v31 }
  0x89   :  { %1760 = vmatprep.mubr.msk.f32.mxu1 %vm2137_vm0, %v2809_v0  ;;  %1752 = vmatprep.subr.mxu1 %v2809_v0 }
  0x8a   :  { %688 = vmatprep.subr.mxu0 %v2215_v45  ;;  %1753 = vmatpush3.msra.mxu1 %v2374_v32  ;;  %v131_v45 = vrot.slane %v122_v41, %v130_v54 }
  0x8b   :  { %1754 = vmatprep.subr.mxu1 %v2809_v0 }
  0x8c   :  { %1755 = vmatpush3.msra.mxu1 %v2380_v33 }
  0x8d   :  { %1756 = vmatprep.subr.mxu1 %v2809_v0 }
  0x8e   :  { %1757 = vmatpush3.msra.mxu1 %v2386_v34 }
  0x8f   :  { %1758 = vmatprep.subr.mxu1 %v2809_v0 }
  0x90   :  { %1759 = vmatpush3.msra.mxu1 %v2392_v35 }
  0x91   :  { %1763 = vmatprep.subr.mxu1 %v2809_v0 }
 0x108   :  { %v205_v42 = vpop.f32.mrf.mxu0 }
 0x109   :  { %v2468_v60 = vadd.f32 %v205_v42, %v127_v44 }
 0x10a   :  { %v207_v51 = vpop.f32.mrf.mxu0 }
 0x10b   :  { %v2475_v34 = vadd.f32 %v207_v51, %v131_v45 }
 0x10e   :  { %v276_v36 = vpop.f32.mrf.mxu1 }
 0x110   :  { %v1692_v37 = vpop.f32.mrf.mxu1 }
 0x111   :  { %v2470_v37 = vrot.slane %v328_v43, %v130_v54 }
 0x128   :  { %v413_v57 = vpop.f32.mrf.mxu0 }
 0x129   :  { %v414_v38 = vadd.f32 %v413_v57, %v2466_v48  ;;  %v134_v57 = vsub.s32 2, %v125_v39 }
 0x12a   :  { %v415_v0 = vpop.f32.mrf.mxu0 }
 0x12b   :  { %v488_v35 = vadd.f32 %v414_v38, %v2468_v60  ;;  %v416_v25 = vadd.f32 %v415_v0, %v2470_v37  ;;  %v2478_v48 = vrot.slane %v328_v43, %v134_v57  ;;  %v135_v38 = vrot.slane %v122_v41, %v134_v57  ;;  %v2841_v41 = vld [vmem:[#allocation15_spill] sm:$0xff]  ;;  %v2843_v57 = vld [vmem:[#allocation16_spill] sm:$0xff] }
 0x12d   :  { %v1509_v27 = vmul.f32 -1.442695, %v488_v35  ;;  %v495_v40 = vadd.f32 %v416_v25, %v2475_v34  ;;  %v2481_v51 = vadd.f32 %v276_v36, %v135_v38  ;;  %v2840_v36 = vld [vmem:[#allocation14_spill] sm:$0xff]  ;;  %v2845_v38 = vld [vmem:[#allocation20_spill] sm:$0xff] }
 0x12f   :  { %1948 = vpow2.f32 %v1509_v27  ;;  %v1510_v24 = vmul.f32 -1.442695, %v495_v40 }
 0x130   :  { %v484_v22 = vpop.f32.mrf.mxu1 }
 0x131   :  { %1950 = vpow2.f32 %v1510_v24  ;;  %v485_v0 = vadd.f32 %v484_v22, %v2478_v48  ;;  %v2838_v22 = vmov 0.0  }
 0x132   :  { %v1727_v42 = vpop.f32.mrf.mxu1 }
 0x13c   :  { %v1949_v44 = vpop.eup %1948 }
 0x13d   :  { %v492_v33 = vadd.f32 1.0, %v1949_v44  ;;  %v2842_v44 = vld [vmem:[#allocation19_spill] sm:$0xff] }
 0x13e   :  { %v1951_v54 = vpop.eup %1950 }
 0x13f   :  { %1952 = vrcp.f32 %v492_v33  ;;  %v499_v35 = vadd.f32 1.0, %v1951_v54  ;;  %v2844_v54 = vld [vmem:[#allocation17_spill] sm:$0xff] }
 0x141   :  { %1954 = vrcp.f32 %v499_v35  ;;  %v2846_v35 = vld [vmem:[#allocation13_spill] sm:$0xff] }
 0x14c   :  { %v1953_v45 = vpop.eup %1952 }
 0x14d   :  { %v502_v25 = vmul.f32 %v1953_v45, %v485_v0 }
 0x14e   :  { %v1955_v24 = vpop.eup %1954 }
 0x14f   :  { %v503_v27 = vadd.f32 %v502_v25, %v2481_v51  ;;  %v505_v40 = vsub.f32 1.0, %v1955_v24  ;;  %v507_v39 = vmul.f32 %v1955_v24, %v2353_v28  ;;  %v2839_v28 = vld [vmem:[#allocation18_spill] sm:$0xff]  ;;  %v2847_v25 = vld [vmem:[#allocation21_spill] sm:$0xff] }
 0x151   :  { %1956 = vtanh.f32 %v503_v27 }
 0x15e   :  { %v1957_v42 = vpop.eup %1956 }
 0x15f   :  { %v506_v33 = vmul.f32 %v1957_v42, %v505_v40 }
 0x161   :  { %v2485_v43 = vadd.f32 %v507_v39, %v506_v33 }
 0x163   :  { %509 = vst [vmem:[#allocation2] sm:$0x1] %v2485_v43  ;;  %575 = vmatmul.mubr.f32.vlgmr.msra.gmra.mxu0 %v2485_v43  ;;  %1761 = vmatmul.mubr.f32.vlgmr.msra.gmra.mxu1 %v2485_v43 }
 0x164   :  { %689 = vmatpush1.msra.mxu0 %v2217_v46  ;;  %1764 = vmatpush3.msra.mxu1 %v2264_v2 }
 0x165   :  { %690 = vmatprep.subr.mxu0 %v2220_v47  ;;  %1765 = vmatprep.subr.mxu1 %v2838_v22 }
 0x166   :  { %691 = vmatpush1.msra.mxu0 %v2223_v49  ;;  %1766 = vmatpush3.msra.mxu1 %v2273_v5 }
 0x167   :  { %692 = vmatprep.subr.mxu0 %v2226_v50  ;;  %1767 = vmatprep.subr.mxu1 %v2838_v22 }
 0x168   :  { %693 = vmatpush1.msra.mxu0 %v2230_v52  ;;  %1768 = vmatpush3.msra.mxu1 %v2283_v8 }
 0x169   :  { %694 = vmatprep.subr.mxu0 %v2233_v53  ;;  %1769 = vmatprep.subr.mxu1 %v2838_v22 }
 0x16a   :  { %695 = vmatpush1.msra.mxu0 %v2237_v55  ;;  %1770 = vmatpush3.msra.mxu1 %v2293_v11 }
 0x16b   :  { %696 = vmatprep.subr.mxu0 %v2240_v56  ;;  %1771 = vmatprep.subr.mxu1 %v2838_v22 }
 0x16c   :  { %697 = vmatpush1.msra.mxu0 %v2244_v58  ;;  %1772 = vmatpush3.msra.mxu1 %v2303_v14 }
 0x16d   :  { %698 = vmatprep.subr.mxu0 %v2247_v59  ;;  %1773 = vmatprep.subr.mxu1 %v2838_v22 }
 0x16e   :  { %699 = vmatpush1.msra.mxu0 %v2251_v61  ;;  %1774 = vmatpush3.msra.mxu1 %v2313_v17 }
 0x16f   :  { %700 = vmatprep.subr.mxu0 %v2254_v62  ;;  %1775 = vmatprep.subr.mxu1 %v2838_v22 }
 0x170   :  { %701 = vmatpush1.msra.mxu0 %v2258_v63  ;;  %1776 = vmatpush3.msra.mxu1 %v2323_v20 }
 0x171   :  { %702 = vmatprep.subr.mxu0 %v2261_v1  ;;  %1777 = vmatprep.subr.mxu1 %v2838_v22 }
 0x172   :  { %703 = vmatpush1.msra.mxu0 %v2267_v3  ;;  %1778 = vmatpush3.msra.mxu1 %v2333_v23 }
 0x173   :  { %704 = vmatprep.subr.mxu0 %v2271_v4  ;;  %1779 = vmatprep.subr.mxu1 %v2838_v22 }
 0x174   :  { %705 = vmatpush1.msra.mxu0 %v2276_v6  ;;  %1780 = vmatpush3.msra.mxu1 %v2343_v26 }
 0x175   :  { %706 = vmatprep.subr.mxu0 %v2280_v7  ;;  %1781 = vmatprep.subr.mxu1 %v2838_v22 }
 0x176   :  { %707 = vmatpush1.msra.mxu0 %v2286_v9  ;;  %1782 = vmatpush3.msra.mxu1 %v2356_v29 }
 0x177   :  { %708 = vmatprep.subr.mxu0 %v2290_v10  ;;  %1783 = vmatprep.subr.mxu1 %v2838_v22 }
 0x178   :  { %709 = vmatpush1.msra.mxu0 %v2296_v12  ;;  %1784 = vmatpush3.msra.mxu1 %v2362_v30 }
 0x179   :  { %710 = vmatprep.subr.mxu0 %v2300_v13  ;;  %1785 = vmatprep.subr.mxu1 %v2838_v22 }
 0x17a   :  { %711 = vmatpush1.msra.mxu0 %v2306_v15  ;;  %1786 = vmatpush3.msra.mxu1 %v2367_v31 }
 0x17b   :  { %712 = vmatprep.subr.mxu0 %v2310_v16  ;;  %1787 = vmatprep.subr.mxu1 %v2838_v22 }
 0x17c   :  { %713 = vmatpush1.msra.mxu0 %v2316_v18  ;;  %1788 = vmatpush3.msra.mxu1 %v2374_v32 }
 0x17d   :  { %714 = vmatprep.subr.mxu0 %v2320_v19  ;;  %1789 = vmatprep.subr.mxu1 %v2838_v22 }
 0x17e   :  { %715 = vmatpush1.msra.mxu0 %v2326_v21  ;;  %1790 = vmatpush3.msra.mxu1 %v2839_v28 }
 0x17f   :  { %716 = vmatprep.subr.mxu0 %v2840_v36  ;;  %1791 = vmatprep.subr.mxu1 %v2838_v22 }
 0x180   :  { %717 = vmatpush1.msra.mxu0 %v2841_v41  ;;  %1792 = vmatpush3.msra.mxu1 %v2842_v44 }
 0x181   :  { %718 = vmatprep.subr.mxu0 %v2843_v57  ;;  %1793 = vmatprep.subr.mxu1 %v2838_v22 }
 0x182   :  { %719 = vmatpush1.msra.mxu0 %v2844_v54  ;;  %752 = vmatprep.mubr.f32.mxu0 %v2838_v22 }
 0x183   :  { %1794 = vmatpush3.msra.mxu1 %v2845_v38  ;;  %1795 = vmatprep.mubr.msk.f32.mxu1 %vm2137_vm0, %v2838_v22 }
 0x184   :  { %865 = vmatprep.subr.mxu0 %v2846_v35  ;;  %1798 = vmatprep.subr.mxu1 %v2838_v22 }
 0x223   :  { %v576_v0 = vpop.f32.mrf.mxu0  ;;  %v647_v45 = vpop.f32.mrf.mxu1 }
 0x224   :  { %v577_v27 = vadd.f32 %v576_v0, %v2847_v25  ;;  %v648_v0 = vadd.f32 %v647_v45, %v2478_v48  ;;  %v2851_v45 = vld [vmem:[#allocation19_spill] sm:$0xff] }
 0x225   :  { %v578_v24 = vpop.f32.mrf.mxu0  ;;  %v1762_v40 = vpop.f32.mrf.mxu1 }
 0x226   :  { %v652_v42 = vrot.slane %v577_v27, 7  ;;  %v579_v33 = vadd.f32 %v578_v24, %v2470_v37  ;;  %v672_v40 = vrot.slane %v648_v0, 7  ;;  %v2854_v0 = vld [vmem:[#allocation20_spill] sm:$0xff] }
 0x228   :  { %v654_v39 = vadd.f32 %v652_v42, %v2468_v60  ;;  %v662_v38 = vrot.slane %v579_v33, 7 }
 0x22a   :  { %v1511_v54 = vmul.f32 -1.442695, %v654_v39  ;;  %v664_v57 = vadd.f32 %v662_v38, %v2475_v34  ;;  %v2853_v39 = vld [vmem:[#allocation17_spill] sm:$0xff] }
 0x22c   :  { %1958 = vpow2.f32 %v1511_v54  ;;  %v1512_v44 = vmul.f32 -1.442695, %v664_v57  ;;  %v680_v54 = vrot.slane %v2485_v43, 7  ;;  %v2848_v43 = vld [vmem:[#allocation18_spill] sm:$0xff] }
 0x22e   :  { %1960 = vpow2.f32 %v1512_v44 }
 0x239   :  { %v1959_v35 = vpop.eup %1958 }
 0x23a   :  { %v658_v41 = vadd.f32 1.0, %v1959_v35 }
 0x23b   :  { %v1961_v36 = vpop.eup %1960 }
 0x23c   :  { %1962 = vrcp.f32 %v658_v41  ;;  %v668_v25 = vadd.f32 1.0, %v1961_v36  ;;  %v2850_v41 = vld [vmem:[#allocation15_spill] sm:$0xff] }
 0x23e   :  { %1964 = vrcp.f32 %v668_v25  ;;  %v2852_v25 = vld [vmem:[#allocation16_spill] sm:$0xff] }
 0x249   :  { %v1963_v27 = vpop.eup %1962 }
 0x24a   :  { %v674_v28 = vmul.f32 %v1963_v27, %v672_v40  ;;  %v2855_v40 = vld [vmem:[#allocation13_spill] sm:$0xff] }
 0x24b   :  { %v1965_v42 = vpop.eup %1964 }
 0x24c   :  { %v675_v24 = vadd.f32 %v674_v28, %v2481_v51  ;;  %v677_v38 = vsub.f32 1.0, %v1965_v42  ;;  %v682_v33 = vmul.f32 %v1965_v42, %v680_v54  ;;  %v2849_v28 = vld [vmem:[#allocation14_spill] sm:$0xff]  ;;  %v2856_v42 = vld [vmem:[#allocation21_spill] sm:$0xff] }
 0x24e   :  { %1966 = vtanh.f32 %v675_v24 }
 0x25b   :  { %v1967_v57 = vpop.eup %1966 }
 0x25c   :  { %v678_v44 = vmul.f32 %v1967_v57, %v677_v38 }
 0x25e   :  { %v2564_v35 = vadd.f32 %v682_v33, %v678_v44 }
 0x260   :  { %684 = vst [vmem:[#allocation2] sm:$0x2] %v2564_v35  ;;  %v686_v36 = vrot.slane %v2564_v35, 1 }
 0x262   :  { %753 = vmatmul.mubr.f32.vlgmr.msra.gmra.mxu0 %v686_v36  ;;  %1796 = vmatmul.mubr.f32.vlgmr.msra.gmra.mxu1 %v686_v36 }
 0x263   :  { %866 = vmatpush1.msra.mxu0 %v2217_v46  ;;  %1799 = vmatpush3.msra.mxu1 %v2264_v2 }
 0x264   :  { %867 = vmatprep.subr.mxu0 %v2220_v47  ;;  %1800 = vmatprep.subr.mxu1 %v2838_v22 }
 0x265   :  { %868 = vmatpush1.msra.mxu0 %v2223_v49  ;;  %1801 = vmatpush3.msra.mxu1 %v2273_v5 }
 0x266   :  { %869 = vmatprep.subr.mxu0 %v2226_v50  ;;  %1802 = vmatprep.subr.mxu1 %v2838_v22 }
 0x267   :  { %870 = vmatpush1.msra.mxu0 %v2230_v52  ;;  %1803 = vmatpush3.msra.mxu1 %v2283_v8 }
 0x268   :  { %871 = vmatprep.subr.mxu0 %v2233_v53  ;;  %1804 = vmatprep.subr.mxu1 %v2838_v22 }
 0x269   :  { %872 = vmatpush1.msra.mxu0 %v2237_v55  ;;  %1805 = vmatpush3.msra.mxu1 %v2293_v11 }
 0x26a   :  { %873 = vmatprep.subr.mxu0 %v2240_v56  ;;  %1806 = vmatprep.subr.mxu1 %v2838_v22 }
 0x26b   :  { %874 = vmatpush1.msra.mxu0 %v2244_v58  ;;  %1807 = vmatpush3.msra.mxu1 %v2303_v14 }
 0x26c   :  { %875 = vmatprep.subr.mxu0 %v2247_v59  ;;  %1808 = vmatprep.subr.mxu1 %v2838_v22 }
 0x26d   :  { %876 = vmatpush1.msra.mxu0 %v2251_v61  ;;  %1809 = vmatpush3.msra.mxu1 %v2313_v17 }
 0x26e   :  { %877 = vmatprep.subr.mxu0 %v2254_v62  ;;  %1810 = vmatprep.subr.mxu1 %v2838_v22 }
 0x26f   :  { %878 = vmatpush1.msra.mxu0 %v2258_v63  ;;  %1811 = vmatpush3.msra.mxu1 %v2323_v20 }
 0x270   :  { %879 = vmatprep.subr.mxu0 %v2261_v1  ;;  %1812 = vmatprep.subr.mxu1 %v2838_v22 }
 0x271   :  { %880 = vmatpush1.msra.mxu0 %v2267_v3  ;;  %1813 = vmatpush3.msra.mxu1 %v2333_v23 }
 0x272   :  { %881 = vmatprep.subr.mxu0 %v2271_v4  ;;  %1814 = vmatprep.subr.mxu1 %v2838_v22 }
 0x273   :  { %882 = vmatpush1.msra.mxu0 %v2276_v6  ;;  %1815 = vmatpush3.msra.mxu1 %v2343_v26 }
 0x274   :  { %883 = vmatprep.subr.mxu0 %v2280_v7  ;;  %1816 = vmatprep.subr.mxu1 %v2838_v22 }
 0x275   :  { %884 = vmatpush1.msra.mxu0 %v2286_v9  ;;  %1817 = vmatpush3.msra.mxu1 %v2356_v29 }
 0x276   :  { %885 = vmatprep.subr.mxu0 %v2290_v10  ;;  %1818 = vmatprep.subr.mxu1 %v2838_v22 }
 0x277   :  { %886 = vmatpush1.msra.mxu0 %v2296_v12  ;;  %1819 = vmatpush3.msra.mxu1 %v2362_v30 }
 0x278   :  { %887 = vmatprep.subr.mxu0 %v2300_v13  ;;  %1820 = vmatprep.subr.mxu1 %v2838_v22 }
 0x279   :  { %888 = vmatpush1.msra.mxu0 %v2306_v15  ;;  %1821 = vmatpush3.msra.mxu1 %v2367_v31 }
 0x27a   :  { %889 = vmatprep.subr.mxu0 %v2310_v16  ;;  %1822 = vmatprep.subr.mxu1 %v2838_v22 }
 0x27b   :  { %890 = vmatpush1.msra.mxu0 %v2316_v18  ;;  %1823 = vmatpush3.msra.mxu1 %v2374_v32 }
 0x27c   :  { %891 = vmatprep.subr.mxu0 %v2320_v19  ;;  %1824 = vmatprep.subr.mxu1 %v2838_v22 }
 0x27d   :  { %892 = vmatpush1.msra.mxu0 %v2326_v21  ;;  %1825 = vmatpush3.msra.mxu1 %v2848_v43 }
 0x27e   :  { %893 = vmatprep.subr.mxu0 %v2849_v28  ;;  %1826 = vmatprep.subr.mxu1 %v2838_v22 }
 0x27f   :  { %894 = vmatpush1.msra.mxu0 %v2850_v41  ;;  %1827 = vmatpush3.msra.mxu1 %v2851_v45 }
 0x280   :  { %895 = vmatprep.subr.mxu0 %v2852_v25  ;;  %1828 = vmatprep.subr.mxu1 %v2838_v22 }
 0x281   :  { %896 = vmatpush1.msra.mxu0 %v2853_v39  ;;  %929 = vmatprep.mubr.f32.mxu0 %v2838_v22 }
 0x282   :  { %1829 = vmatpush3.msra.mxu1 %v2854_v0  ;;  %1830 = vmatprep.mubr.msk.f32.mxu1 %vm2137_vm0, %v2838_v22 }
 0x283   :  { %1042 = vmatprep.subr.mxu0 %v2855_v40  ;;  %1833 = vmatprep.subr.mxu1 %v2838_v22 }
 0x322   :  { %v754_v27 = vpop.f32.mrf.mxu0  ;;  %v825_v24 = vpop.f32.mrf.mxu1 }
 0x323   :  { %v755_v54 = vadd.f32 %v754_v27, %v2856_v42  ;;  %v826_v27 = vadd.f32 %v825_v24, %v2478_v48 }
 0x324   :  { %v756_v38 = vpop.f32.mrf.mxu0  ;;  %v1797_v57 = vpop.f32.mrf.mxu1 }
 0x325   :  { %v830_v44 = vrot.slane %v755_v54, 6  ;;  %v757_v33 = vadd.f32 %v756_v38, %v2470_v37  ;;  %v850_v57 = vrot.slane %v826_v27, 6 }
 0x327   :  { %v832_v36 = vadd.f32 %v830_v44, %v2468_v60  ;;  %v840_v0 = vrot.slane %v757_v33, 6 }
 0x329   :  { %v1513_v39 = vmul.f32 -1.442695, %v832_v36  ;;  %v842_v25 = vadd.f32 %v840_v0, %v2475_v34  ;;  %v857_v0 = vrot.slane %v2564_v35, 7 }
 0x32b   :  { %1968 = vpow2.f32 %v1513_v39  ;;  %v1514_v45 = vmul.f32 -1.442695, %v842_v25 }
 0x32d   :  { %1970 = vpow2.f32 %v1514_v45 }
 0x338   :  { %v1969_v40 = vpop.eup %1968 }
 0x339   :  { %v836_v41 = vadd.f32 1.0, %v1969_v40 }
 0x33a   :  { %v1971_v28 = vpop.eup %1970 }
 0x33b   :  { %1972 = vrcp.f32 %v836_v41  ;;  %v846_v42 = vadd.f32 1.0, %v1971_v28 }
 0x33d   :  { %1974 = vrcp.f32 %v846_v42 }
 0x348   :  { %v1973_v54 = vpop.eup %1972 }
 0x349   :  { %v852_v43 = vmul.f32 %v1973_v54, %v850_v57  ;;  %v2009_v54 = vld [vmem:[#allocation6 + $0x168] sm:$0xff] }
 0x34a   :  { %v1975_v44 = vpop.eup %1974 }
 0x34b   :  { %v853_v38 = vadd.f32 %v852_v43, %v2481_v51  ;;  %v855_v39 = vsub.f32 1.0, %v1975_v44  ;;  %v859_v33 = vmul.f32 %v1975_v44, %v857_v0  ;;  %v2011_v44 = vld [vmem:[#allocation6 + $0x158] sm:$0xff]  ;;  %v2013_v0 = vld [vmem:[#allocation6 + $0x160] sm:$0xff] }
 0x34d   :  { %1976 = vtanh.f32 %v853_v38  ;;  %v2010_v38 = vld [vmem:[#allocation6 + $0x178] sm:$0xff] }
 0x35a   :  { %v1977_v25 = vpop.eup %1976 }
 0x35b   :  { %v856_v45 = vmul.f32 %v1977_v25, %v855_v39  ;;  %v2012_v39 = vld [vmem:[#allocation6 + $0x150] sm:$0xff]  ;;  %v2014_v25 = vld [vmem:[#allocation6 + $0x140] sm:$0xff] }
 0x35d   :  { %v2642_v36 = vadd.f32 %v859_v33, %v856_v45  ;;  %v2015_v45 = vld [vmem:[#allocation6 + $0x138] sm:$0xff]  ;;  %v2016_v33 = vld [vmem:[#allocation6 + $0x148] sm:$0xff] }
 0x35f   :  { %861 = vst [vmem:[#allocation2] sm:$0x4] %v2642_v36  ;;  %v863_v28 = vrot.slane %v2642_v36, 2  ;;  %v1034_v41 = vrot.slane %v2642_v36, 7  ;;  %v2017_v36 = vld [vmem:[#allocation6 + $0x128] sm:$0xff] }
 0x361   :  { %930 = vmatmul.mubr.f32.vlgmr.msra.gmra.mxu0 %v863_v28  ;;  %1831 = vmatmul.mubr.f32.vlgmr.msra.gmra.mxu1 %v863_v28  ;;  %v2018_v28 = vld [vmem:[#allocation6 + $0x120] sm:$0xff] }
 0x362   :  { %1043 = vmatpush1.msra.mxu0 %v2217_v46  ;;  %1834 = vmatpush3.msra.mxu1 %v2264_v2  ;;  %v2857_v46 = vld [vmem:[#allocation18_spill] sm:$0xff] }
 0x363   :  { %1044 = vmatprep.subr.mxu0 %v2220_v47  ;;  %1835 = vmatprep.subr.mxu1 %v2838_v22  ;;  %v2858_v47 = vld [vmem:[#allocation14_spill] sm:$0xff] }
 0x364   :  { %1045 = vmatpush1.msra.mxu0 %v2223_v49  ;;  %1836 = vmatpush3.msra.mxu1 %v2273_v5  ;;  %v2859_v49 = vld [vmem:[#allocation15_spill] sm:$0xff] }
 0x365   :  { %1046 = vmatprep.subr.mxu0 %v2226_v50  ;;  %1837 = vmatprep.subr.mxu1 %v2838_v22  ;;  %v2860_v50 = vld [vmem:[#allocation19_spill] sm:$0xff] }
 0x366   :  { %1047 = vmatpush1.msra.mxu0 %v2230_v52  ;;  %1838 = vmatpush3.msra.mxu1 %v2283_v8  ;;  %v2861_v52 = vld [vmem:[#allocation16_spill] sm:$0xff] }
 0x367   :  { %1048 = vmatprep.subr.mxu0 %v2233_v53  ;;  %1839 = vmatprep.subr.mxu1 %v2838_v22  ;;  %v2862_v53 = vld [vmem:[#allocation17_spill] sm:$0xff] }
 0x368   :  { %1049 = vmatpush1.msra.mxu0 %v2237_v55  ;;  %1840 = vmatpush3.msra.mxu1 %v2293_v11  ;;  %v2863_v55 = vld [vmem:[#allocation20_spill] sm:$0xff] }
 0x369   :  { %1050 = vmatprep.subr.mxu0 %v2240_v56  ;;  %1841 = vmatprep.subr.mxu1 %v2838_v22  ;;  %v2008_v56 = vld [vmem:[#allocation6 + $0x170] sm:$0xff] }
 0x36a   :  { %1051 = vmatpush1.msra.mxu0 %v2244_v58  ;;  %1842 = vmatpush3.msra.mxu1 %v2303_v14 }
 0x36b   :  { %1052 = vmatprep.subr.mxu0 %v2247_v59  ;;  %1843 = vmatprep.subr.mxu1 %v2838_v22 }
 0x36c   :  { %1053 = vmatpush1.msra.mxu0 %v2251_v61  ;;  %1844 = vmatpush3.msra.mxu1 %v2313_v17  ;;  %v2864_v61 = vld [vmem:[#allocation21_spill] sm:$0xff] }
 0x36d   :  { %1054 = vmatprep.subr.mxu0 %v2254_v62  ;;  %1845 = vmatprep.subr.mxu1 %v2838_v22 }
 0x36e   :  { %1055 = vmatpush1.msra.mxu0 %v2258_v63  ;;  %1846 = vmatpush3.msra.mxu1 %v2323_v20 }
 0x36f   :  { %1056 = vmatprep.subr.mxu0 %v2261_v1  ;;  %1847 = vmatprep.subr.mxu1 %v2838_v22 }
 0x370   :  { %1057 = vmatpush1.msra.mxu0 %v2267_v3  ;;  %1848 = vmatpush3.msra.mxu1 %v2333_v23 }
 0x371   :  { %1058 = vmatprep.subr.mxu0 %v2271_v4  ;;  %1849 = vmatprep.subr.mxu1 %v2838_v22 }
 0x372   :  { %1059 = vmatpush1.msra.mxu0 %v2276_v6  ;;  %1850 = vmatpush3.msra.mxu1 %v2343_v26 }
 0x373   :  { %1060 = vmatprep.subr.mxu0 %v2280_v7  ;;  %1851 = vmatprep.subr.mxu1 %v2838_v22 }
 0x374   :  { %1061 = vmatpush1.msra.mxu0 %v2286_v9  ;;  %1852 = vmatpush3.msra.mxu1 %v2356_v29 }
 0x375   :  { %1062 = vmatprep.subr.mxu0 %v2290_v10  ;;  %1853 = vmatprep.subr.mxu1 %v2838_v22 }
 0x376   :  { %1063 = vmatpush1.msra.mxu0 %v2296_v12  ;;  %1854 = vmatpush3.msra.mxu1 %v2362_v30 }
 0x377   :  { %1064 = vmatprep.subr.mxu0 %v2300_v13  ;;  %1855 = vmatprep.subr.mxu1 %v2838_v22 }
 0x378   :  { %1065 = vmatpush1.msra.mxu0 %v2306_v15  ;;  %1856 = vmatpush3.msra.mxu1 %v2367_v31 }
 0x379   :  { %1066 = vmatprep.subr.mxu0 %v2310_v16  ;;  %1857 = vmatprep.subr.mxu1 %v2838_v22 }
 0x37a   :  { %1067 = vmatpush1.msra.mxu0 %v2316_v18  ;;  %1858 = vmatpush3.msra.mxu1 %v2374_v32 }
 0x37b   :  { %1068 = vmatprep.subr.mxu0 %v2320_v19  ;;  %1859 = vmatprep.subr.mxu1 %v2838_v22 }
 0x37c   :  { %1069 = vmatpush1.msra.mxu0 %v2326_v21  ;;  %1860 = vmatpush3.msra.mxu1 %v2857_v46 }
 0x37d   :  { %1070 = vmatprep.subr.mxu0 %v2858_v47  ;;  %1861 = vmatprep.subr.mxu1 %v2838_v22  ;;  %v2019_v47 = vld [vmem:[#allocation6 + $0x110] sm:$0xff] }
 0x37e   :  { %1071 = vmatpush1.msra.mxu0 %v2859_v49  ;;  %1862 = vmatpush3.msra.mxu1 %v2860_v50  ;;  %v2020_v49 = vld [vmem:[#allocation6 + $0x108] sm:$0xff] }
 0x37f   :  { %1072 = vmatprep.subr.mxu0 %v2861_v52  ;;  %1863 = vmatprep.subr.mxu1 %v2838_v22  ;;  %v2021_v52 = vld [vmem:[#allocation6 + $0xf8] sm:$0xff] }
 0x380   :  { %1073 = vmatpush1.msra.mxu0 %v2862_v53  ;;  %1106 = vmatprep.mubr.f32.mxu0 %v2838_v22  ;;  %v2022_v53 = vld [vmem:[#allocation6 + $0xf0] sm:$0xff] }
 0x381   :  { %1864 = vmatpush3.msra.mxu1 %v2863_v55  ;;  %1865 = vmatprep.mubr.msk.f32.mxu1 %vm2137_vm0, %v2838_v22 }
 0x382   :  { %1219 = vmatprep.subr.mxu0 %v2008_v56  ;;  %1868 = vmatprep.subr.mxu1 %v2838_v22  ;;  %v2023_v56 = vld [vmem:[#allocation6 + $0xe0] sm:$0xff] }
 0x421   :  { %v931_v58 = vpop.f32.mrf.mxu0  ;;  %v1002_v59 = vpop.f32.mrf.mxu1 }
 0x422   :  { %v932_v62 = vadd.f32 %v931_v58, %v2864_v61  ;;  %v1003_v13 = vadd.f32 %v1002_v59, %v2478_v48  ;;  %v2025_v58 = vld [vmem:[#allocation6 + $0xc8] sm:$0xff]  ;;  %v2027_v59 = vld [vmem:[#allocation6 + $0xb0] sm:$0xff] }
 0x423   :  { %v933_v63 = vpop.f32.mrf.mxu0  ;;  %v1832_v1 = vpop.f32.mrf.mxu1 }
 0x424   :  { %v1007_v2 = vrot.slane %v932_v62, 5  ;;  %v934_v3 = vadd.f32 %v933_v63, %v2470_v37  ;;  %v1027_v16 = vrot.slane %v1003_v13, 5  ;;  %v2029_v62 = vld [vmem:[#allocation6 + $0x98] sm:$0xff]  ;;  %v2031_v63 = vld [vmem:[#allocation6 + $0x80] sm:$0xff]  ;;  %v2033_v1 = vld [vmem:[#allocation6 + $0x68] sm:$0xff] }
 0x426   :  { %v1009_v4 = vadd.f32 %v1007_v2, %v2468_v60  ;;  %v1017_v6 = vrot.slane %v934_v3, 5  ;;  %v2035_v2 = vld [vmem:[#allocation6 + $0x50] sm:$0xff]  ;;  %v2037_v3 = vld [vmem:[#allocation6 + $0x38] sm:$0xff] }
 0x428   :  { %v1515_v5 = vmul.f32 -1.442695, %v1009_v4  ;;  %v1019_v7 = vadd.f32 %v1017_v6, %v2475_v34  ;;  %v2039_v4 = vld [vmem:[#allocation6 + $0x20] sm:$0xff] }
 0x42a   :  { %1978 = vpow2.f32 %v1515_v5  ;;  %v1516_v8 = vmul.f32 -1.442695, %v1019_v7  ;;  %v2041_v5 = vld [vmem:[#allocation6 + $0x8] sm:$0xff] }
 0x42c   :  { %1980 = vpow2.f32 %v1516_v8 }
 0x437   :  { %v1979_v9 = vpop.eup %1978 }
 0x438   :  { %v1013_v10 = vadd.f32 1.0, %v1979_v9 }
 0x439   :  { %v1981_v12 = vpop.eup %1980 }
 0x43a   :  { %1982 = vrcp.f32 %v1013_v10  ;;  %v1023_v15 = vadd.f32 1.0, %v1981_v12 }
 0x43c   :  { %1984 = vrcp.f32 %v1023_v15 }
 0x447   :  { %v1983_v18 = vpop.eup %1982 }
 0x448   :  { %v1029_v19 = vmul.f32 %v1983_v18, %v1027_v16 }
 0x449   :  { %v1985_v35 = vpop.eup %1984 }
 0x44a   :  { %v1030_v21 = vadd.f32 %v1029_v19, %v2481_v51  ;;  %v1032_v43 = vsub.f32 1.0, %v1985_v35  ;;  %v1036_v40 = vmul.f32 %v1985_v35, %v1034_v41 }
 0x44c   :  { %1986 = vtanh.f32 %v1030_v21 }
 0x459   :  { %v1987_v24 = vpop.eup %1986 }
 0x45a   :  { %v1033_v42 = vmul.f32 %v1987_v24, %v1032_v43 }
 0x45c   :  { %v2719_v27 = vadd.f32 %v1036_v40, %v1033_v42 }
 0x45e   :  { %1038 = vst [vmem:[#allocation2] sm:$0x8] %v2719_v27  ;;  %v1040_v57 = vrot.slane %v2719_v27, 3 }
 0x460   :  { %1107 = vmatmul.mubr.f32.vlgmr.msra.gmra.mxu0 %v1040_v57  ;;  %1866 = vmatmul.mubr.f32.vlgmr.msra.gmra.mxu1 %v1040_v57 }
 0x461   :  { %1220 = vmatpush1.msra.mxu0 %v2009_v54  ;;  %1869 = vmatpush3.msra.mxu1 %v2010_v38  ;;  %v1211_v38 = vrot.slane %v2719_v27, 7  ;;  %v1408_v27 = vld [vmem:[#allocation8 + $0x68] sm:$0xff] }
 0x462   :  { %1221 = vmatprep.subr.mxu0 %v2011_v44  ;;  %1870 = vmatprep.subr.mxu1 %v2838_v22 }
 0x463   :  { %1222 = vmatpush1.msra.mxu0 %v2012_v39  ;;  %1871 = vmatpush3.msra.mxu1 %v2013_v0 }
 0x464   :  { %1223 = vmatprep.subr.mxu0 %v2014_v25  ;;  %1872 = vmatprep.subr.mxu1 %v2838_v22 }
 0x465   :  { %1224 = vmatpush1.msra.mxu0 %v2015_v45  ;;  %1873 = vmatpush3.msra.mxu1 %v2016_v33  ;;  %v1410_v33 = vld [vmem:[#allocation8 + $0x78] sm:$0xff] }
 0x466   :  { %1225 = vmatprep.subr.mxu0 %v2017_v36  ;;  %1874 = vmatprep.subr.mxu1 %v2838_v22  ;;  %v1409_v36 = vld [vmem:[#allocation8 + $0x70] sm:$0xff] }
 0x467   :  { %1226 = vmatpush1.msra.mxu0 %v2018_v28  ;;  %1875 = vmatpush3.msra.mxu1 %v2293_v11  ;;  %v2024_v11 = vld [vmem:[#allocation6 + $0xd8] sm:$0xff]  ;;  %v1407_v28 = vld [vmem:[#allocation8 + $0x60] sm:$0xff] }
 0x468   :  { %1227 = vmatprep.subr.mxu0 %v2019_v47  ;;  %1876 = vmatprep.subr.mxu1 %v2838_v22  ;;  %v1406_v47 = vld [vmem:[#allocation8 + $0x58] sm:$0xff] }
 0x469   :  { %1228 = vmatpush1.msra.mxu0 %v2020_v49  ;;  %1877 = vmatpush3.msra.mxu1 %v2303_v14  ;;  %v2026_v14 = vld [vmem:[#allocation6 + $0xc0] sm:$0xff]  ;;  %v1405_v49 = vld [vmem:[#allocation8 + $0x50] sm:$0xff] }
 0x46a   :  { %1229 = vmatprep.subr.mxu0 %v2021_v52  ;;  %1878 = vmatprep.subr.mxu1 %v2838_v22  ;;  %v1404_v52 = vld [vmem:[#allocation8 + $0x48] sm:$0xff] }
 0x46b   :  { %1230 = vmatpush1.msra.mxu0 %v2022_v53  ;;  %1879 = vmatpush3.msra.mxu1 %v2313_v17  ;;  %v2028_v17 = vld [vmem:[#allocation6 + $0xa8] sm:$0xff]  ;;  %v1403_v53 = vld [vmem:[#allocation8 + $0x40] sm:$0xff] }
 0x46c   :  { %1231 = vmatprep.subr.mxu0 %v2023_v56  ;;  %1880 = vmatprep.subr.mxu1 %v2838_v22  ;;  %v1402_v56 = vld [vmem:[#allocation8 + $0x38] sm:$0xff] }
 0x46d   :  { %1232 = vmatpush1.msra.mxu0 %v2024_v11  ;;  %1881 = vmatpush3.msra.mxu1 %v2323_v20  ;;  %v2030_v20 = vld [vmem:[#allocation6 + $0x90] sm:$0xff] }
 0x46e   :  { %1233 = vmatprep.subr.mxu0 %v2025_v58  ;;  %1882 = vmatprep.subr.mxu1 %v2838_v22  ;;  %v1401_v11 = vld [vmem:[#allocation8 + $0x30] sm:$0xff]  ;;  %v1400_v58 = vld [vmem:[#allocation8 + $0x28] sm:$0xff] }
 0x46f   :  { %1234 = vmatpush1.msra.mxu0 %v2026_v14  ;;  %1883 = vmatpush3.msra.mxu1 %v2333_v23  ;;  %v2032_v23 = vld [vmem:[#allocation6 + $0x78] sm:$0xff]  ;;  %v1399_v14 = vld [vmem:[#allocation8 + $0x20] sm:$0xff] }
 0x470   :  { %1235 = vmatprep.subr.mxu0 %v2027_v59  ;;  %1884 = vmatprep.subr.mxu1 %v2838_v22  ;;  %v1398_v59 = vld [vmem:[#allocation8 + $0x18] sm:$0xff] }
 0x471   :  { %1236 = vmatpush1.msra.mxu0 %v2028_v17  ;;  %1885 = vmatpush3.msra.mxu1 %v2343_v26  ;;  %v2034_v26 = vld [vmem:[#allocation6 + $0x60] sm:$0xff]  ;;  %v1397_v17 = vld [vmem:[#allocation8 + $0x10] sm:$0xff] }
 0x472   :  { %1237 = vmatprep.subr.mxu0 %v2029_v62  ;;  %1886 = vmatprep.subr.mxu1 %v2838_v22  ;;  %v1396_v62 = vld [vmem:[#allocation8 + $0x8] sm:$0xff] }
 0x473   :  { %1238 = vmatpush1.msra.mxu0 %v2030_v20  ;;  %1887 = vmatpush3.msra.mxu1 %v2356_v29  ;;  %v2036_v29 = vld [vmem:[#allocation6 + $0x48] sm:$0xff]  ;;  %v1395_v20 = vld [vmem:[#allocation8] sm:$0xff] }
 0x474   :  { %1239 = vmatprep.subr.mxu0 %v2031_v63  ;;  %1888 = vmatprep.subr.mxu1 %v2838_v22 }
 0x475   :  { %1240 = vmatpush1.msra.mxu0 %v2032_v23  ;;  %1889 = vmatpush3.msra.mxu1 %v2362_v30  ;;  %v2038_v30 = vld [vmem:[#allocation6 + $0x30] sm:$0xff] }
 0x476   :  { %1241 = vmatprep.subr.mxu0 %v2033_v1  ;;  %1890 = vmatprep.subr.mxu1 %v2838_v22 }
 0x477   :  { %1242 = vmatpush1.msra.mxu0 %v2034_v26  ;;  %1891 = vmatpush3.msra.mxu1 %v2367_v31  ;;  %v2040_v31 = vld [vmem:[#allocation6 + $0x18] sm:$0xff] }
 0x478   :  { %1243 = vmatprep.subr.mxu0 %v2035_v2  ;;  %1892 = vmatprep.subr.mxu1 %v2838_v22 }
 0x479   :  { %1244 = vmatpush1.msra.mxu0 %v2036_v29  ;;  %1893 = vmatpush3.msra.mxu1 %v2374_v32  ;;  %v2042_v32 = vld [vmem:[#allocation6] sm:$0xff] }
 0x47a   :  { %1245 = vmatprep.subr.mxu0 %v2037_v3  ;;  %1894 = vmatprep.subr.mxu1 %v2838_v22 }
 0x47b   :  { %1246 = vmatpush1.msra.mxu0 %v2038_v30  ;;  %1895 = vmatpush3.msra.mxu1 %v2857_v46 }
 0x47c   :  { %1247 = vmatprep.subr.mxu0 %v2039_v4  ;;  %1896 = vmatprep.subr.mxu1 %v2838_v22 }
 0x47d   :  { %1248 = vmatpush1.msra.mxu0 %v2040_v31  ;;  %1897 = vmatpush3.msra.mxu1 %v2860_v50 }
 0x47e   :  { %1249 = vmatprep.subr.mxu0 %v2041_v5  ;;  %1898 = vmatprep.subr.mxu1 %v2838_v22 }
 0x47f   :  { %1250 = vmatpush1.msra.mxu0 %v2042_v32  ;;  %1283 = vmatprep.mubr.f32.mxu0 %v2838_v22 }
 0x480   :  { %1899 = vmatpush3.msra.mxu1 %v2863_v55  ;;  %1900 = vmatprep.mubr.msk.f32.mxu1 %vm2137_vm0, %v2838_v22 }
 0x481   :  { %1903 = vmatprep.subr.mxu0 %v2838_v22 }
 0x520   :  { %v1108_v46 = vpop.f32.mrf.mxu0  ;;  %v1179_v6 = vpop.f32.mrf.mxu1 }
 0x521   :  { %v1109_v7 = vadd.f32 %v1108_v46, %v2864_v61  ;;  %v1180_v35 = vadd.f32 %v1179_v6, %v2478_v48 }
 0x522   :  { %v1110_v50 = vpop.f32.mrf.mxu0  ;;  %v1867_v8 = vpop.f32.mrf.mxu1 }
 0x523   :  { %v1184_v9 = vrot.slane %v1109_v7, 4  ;;  %v1111_v10 = vadd.f32 %v1110_v50, %v2470_v37  ;;  %v1204_v41 = vrot.slane %v1180_v35, 4 }
 0x525   :  { %v1186_v12 = vadd.f32 %v1184_v9, %v2468_v60  ;;  %v1194_v15 = vrot.slane %v1111_v10, 4 }
 0x527   :  { %v1517_v13 = vmul.f32 -1.442695, %v1186_v12  ;;  %v1196_v55 = vadd.f32 %v1194_v15, %v2475_v34 }
 0x529   :  { %1988 = vpow2.f32 %v1517_v13  ;;  %v1518_v16 = vmul.f32 -1.442695, %v1196_v55 }
 0x52b   :  { %1990 = vpow2.f32 %v1518_v16 }
 0x536   :  { %v1989_v18 = vpop.eup %1988 }
 0x537   :  { %v1190_v19 = vadd.f32 1.0, %v1989_v18 }
 0x538   :  { %v1991_v21 = vpop.eup %1990 }
 0x539   :  { %1992 = vrcp.f32 %v1190_v19  ;;  %v1200_v43 = vadd.f32 1.0, %v1991_v21 }
 0x53b   :  { %1994 = vrcp.f32 %v1200_v43 }
 0x546   :  { %v1993_v24 = vpop.eup %1992 }
 0x547   :  { %v1206_v42 = vmul.f32 %v1993_v24, %v1204_v41 }
 0x548   :  { %v1995_v57 = vpop.eup %1994 }
 0x549   :  { %v1207_v40 = vadd.f32 %v1206_v42, %v2481_v51  ;;  %v1209_v54 = vsub.f32 1.0, %v1995_v57  ;;  %v1213_v0 = vmul.f32 %v1995_v57, %v1211_v38 }
 0x54b   :  { %1996 = vtanh.f32 %v1207_v40 }
 0x558   :  { %v1997_v44 = vpop.eup %1996 }
 0x559   :  { %v1210_v39 = vmul.f32 %v1997_v44, %v1209_v54 }
 0x55b   :  { %v2762_v25 = vadd.f32 %v1213_v0, %v1210_v39 }
 0x55d   :  { %1215 = vst [vmem:[#allocation2] sm:$0x10] %v2762_v25  ;;  %v1217_v45 = vrot.slane %v2762_v25, 4  ;;  %v1388_v10 = vrot.slane %v2762_v25, 7 }
 0x55f   :  { %1284 = vmatmul.mubr.f32.vlgmr.msra.gmra.mxu0 %v1217_v45  ;;  %1901 = vmatmul.mubr.f32.vlgmr.msra.gmra.mxu1 %v1217_v45 }
 0x560   :  { %1935 = vmatprep.mubr.msk.f32.mxu0 %vm2137_vm0, %v2838_v22  ;;  %1904 = vmatpush3.msra.mxu0 %v1410_v33 }
 0x561   :  { %1905 = vmatprep.subr.mxu0 %v2838_v22 }
 0x562   :  { %1906 = vmatpush3.msra.mxu0 %v1409_v36 }
 0x563   :  { %1907 = vmatprep.subr.mxu0 %v2838_v22 }
 0x564   :  { %1908 = vmatpush3.msra.mxu0 %v1408_v27 }
 0x565   :  { %1909 = vmatprep.subr.mxu0 %v2838_v22 }
 0x566   :  { %1910 = vmatpush3.msra.mxu0 %v1407_v28 }
 0x567   :  { %1911 = vmatprep.subr.mxu0 %v2838_v22 }
 0x568   :  { %1912 = vmatpush3.msra.mxu0 %v1406_v47 }
 0x569   :  { %1913 = vmatprep.subr.mxu0 %v2838_v22 }
 0x56a   :  { %1914 = vmatpush3.msra.mxu0 %v1405_v49 }
 0x56b   :  { %1915 = vmatprep.subr.mxu0 %v2838_v22 }
 0x56c   :  { %1916 = vmatpush3.msra.mxu0 %v1404_v52 }
 0x56d   :  { %1917 = vmatprep.subr.mxu0 %v2838_v22 }
 0x56e   :  { %1918 = vmatpush3.msra.mxu0 %v1403_v53 }
 0x56f   :  { %1919 = vmatprep.subr.mxu0 %v2838_v22 }
 0x570   :  { %1920 = vmatpush3.msra.mxu0 %v1402_v56 }
 0x571   :  { %1921 = vmatprep.subr.mxu0 %v2838_v22 }
 0x572   :  { %1922 = vmatpush3.msra.mxu0 %v1401_v11 }
 0x573   :  { %1923 = vmatprep.subr.mxu0 %v2838_v22 }
 0x574   :  { %1924 = vmatpush3.msra.mxu0 %v1400_v58 }
 0x575   :  { %1925 = vmatprep.subr.mxu0 %v2838_v22 }
 0x576   :  { %1926 = vmatpush3.msra.mxu0 %v1399_v14 }
 0x577   :  { %1927 = vmatprep.subr.mxu0 %v2838_v22 }
 0x578   :  { %1928 = vmatpush3.msra.mxu0 %v1398_v59 }
 0x579   :  { %1929 = vmatprep.subr.mxu0 %v2838_v22 }
 0x57a   :  { %1930 = vmatpush3.msra.mxu0 %v1397_v17 }
 0x57b   :  { %1931 = vmatprep.subr.mxu0 %v2838_v22 }
 0x57c   :  { %1932 = vmatpush3.msra.mxu0 %v1396_v62 }
 0x57d   :  { %1933 = vmatprep.subr.mxu0 %v2838_v22 }
 0x57e   :  { %1934 = vmatpush3.msra.mxu0 %v1395_v20 }
 0x61f   :  { %v1285_v63 = vpop.f32.mrf.mxu0  ;;  %v1356_v23 = vpop.f32.mrf.mxu1 }
 0x620   :  { %v1286_v1 = vadd.f32 %v1285_v63, %v2864_v61  ;;  %v1357_v61 = vadd.f32 %v1356_v23, %v2478_v48 }
 0x621   :  { %v1287_v26 = vpop.f32.mrf.mxu0  ;;  %v1902_v2 = vpop.f32.mrf.mxu1 }
 0x622   :  { %v1361_v29 = vrot.slane %v1286_v1, 3  ;;  %v1288_v3 = vadd.f32 %v1287_v26, %v2470_v37  ;;  %v1381_v50 = vrot.slane %v1357_v61, 3 }
 0x624   :  { %v1363_v30 = vadd.f32 %v1361_v29, %v2468_v60  ;;  %v1371_v31 = vrot.slane %v1288_v3, 3 }
 0x626   :  { %v1519_v4 = vmul.f32 -1.442695, %v1363_v30  ;;  %v1373_v5 = vadd.f32 %v1371_v31, %v2475_v34 }
 0x628   :  { %1998 = vpow2.f32 %v1519_v4  ;;  %v1520_v32 = vmul.f32 -1.442695, %v1373_v5 }
 0x62a   :  { %2000 = vpow2.f32 %v1520_v32 }
 0x635   :  { %v1999_v22 = vpop.eup %1998 }
 0x636   :  { %v1367_v46 = vadd.f32 1.0, %v1999_v22 }
 0x637   :  { %v2001_v6 = vpop.eup %2000 }
 0x638   :  { %2002 = vrcp.f32 %v1367_v46  ;;  %v1377_v7 = vadd.f32 1.0, %v2001_v6 }
 0x63a   :  { %2004 = vrcp.f32 %v1377_v7 }
 0x645   :  { %v2003_v8 = vpop.eup %2002 }
 0x646   :  { %v1383_v9 = vmul.f32 %v2003_v8, %v1381_v50 }
 0x647   :  { %v2005_v37 = vpop.eup %2004 }
 0x648   :  { %v1384_v60 = vadd.f32 %v1383_v9, %v2481_v51  ;;  %v1386_v34 = vsub.f32 1.0, %v2005_v37  ;;  %v1390_v15 = vmul.f32 %v2005_v37, %v1388_v10  ;;  %v1521_v51 = vld [vmem:[%s2806_s7] ss:$0 sm:$0xff] }
 0x64a   :  { %2006 = vtanh.f32 %v1384_v60 }
 0x657   :  { %v2007_v12 = vpop.eup %2006 }
 0x658   :  { %v1387_v13 = vmul.f32 %v2007_v12, %v1386_v34 }
 0x65a   :  { %v1391_v55 = vadd.f32 %v1390_v15, %v1387_v13 }
 0x65c   :  { %1392 = vst [vmem:[#allocation2] sm:$0x20] %v1391_v55  ;;  %1393 = vst [vmem:[%s2808_s9 - $0x5] sm:$0x20] %v1391_v55 }
 0x663   :  { %v1394_v48 = vld [vmem:[#allocation2] sm:$0xff] }
 0x664   :  { %1936 = vmatmul.mubr.f32.vlgmr.msra.gmra.mxu0 %v1394_v48 }
 0x724   :  { %v1484_v16 = vpop.f32.mrf.mxu0 }
 0x725   :  { %v1485_v18 = vadd.f32 %v1521_v51, %v1484_v16 }
 0x726   :  { %v1937_v19 = vpop.f32.mrf.mxu0 }
 0x727   :  { %1488 = vst [vmem:[#allocation9] sm:$0xff] %v1485_v18 }
 0x728   :  { %2114 = shalt.err (!%p2111_p5)
}
 0x729   :  { %1498 = dma.vmem_to_hbm [thread:$0]  %s1496_s13, 128, %s2807_s8, [#allocation5]  }
 0x72a   :  { %2127 = dma.done.wait [#allocation5], 128  }
 0x72b   :  { %2128 = vsyncadd [#allocation5], 4294967168 }
 0x72c   :  { %1506 = vsyncpa [#allocation4], 1 }
 0x72d   :  { %1507 = vsyncpa [#allocation7], 1 }
 0x72e   :  { %1508 = vsyncpa [#allocation5], 1 }

</bundles_post_ra>
